<compile_context>
chip_gen: v5e
topology: v5e:2x2
jax: 0.10.0
libtpu: 0.0.40
codegen_flags: <defaults>
</compile_context>

<pallas_src>
import numpy as np

import jax
import jax.numpy as jnp
from jax import lax
from jax.experimental import pallas as pl
from jax.experimental.pallas import tpu as pltpu


# ------------------------------ fused kernel ------------------------------- #

def _fused_net_kernel(x_ref,
                      a1, c1, b1,
                      a2, c2, b2,
                      a3, c3, b3,
                      a4, c4, b4,
                      a5a, a5b, c5, b5,
                      a6a, a6b, c6, b6,
                      out_ref):
    f32 = jnp.float32

    def layer(xs, a_refs, c_ref, b_ref, relu):
        # xs:     list of (Cin_i*H, W) activations (split-K skip connections)
        # a_refs: matching list of (k*Cout*Ho, Cin_i*H) fused weight+row-gather mats
        # c_ref:  (k, W, Wo) per-tap 0/1 column-gather matrices (tiny)
        # b_ref:  (Cout*Ho, 1) bias column (lane-broadcast on add)
        k = c_ref.shape[0]
        y = jnp.dot(a_refs[0][...], xs[0], preferred_element_type=f32)
        for a_ref, xv in zip(a_refs[1:], xs[1:]):
            y = y + jnp.dot(a_ref[...], xv, preferred_element_type=f32)
        rows = y.shape[0] // k
        acc = b_ref[...]                                   # (rows, 1)
        for kw in range(k):
            acc = acc + jnp.dot(y[kw * rows:(kw + 1) * rows, :], c_ref[kw],
                                preferred_element_type=f32)
        if relu:
            acc = jnp.maximum(acc, 0.0)
        return acc

    x0 = x_ref[0]                                          # (3*16, 16)
    x1 = layer([x0], [a1], c1, b1, True)                   # (4*8,  8)
    x2 = layer([x1], [a2], c2, b2, True)                   # (8*4,  4)
    x3 = layer([x2], [a3], c3, b3, True)                   # (16*2, 2)
    x4 = layer([x3], [a4], c4, b4, True)                   # (8*4,  4)
    x5 = layer([x4, x2], [a5a, a5b], c5, b5, True)         # (4*8,  8)
    x6 = layer([x5, x1], [a6a, a6b], c6, b6, False)        # (3*16, 16)
    out_ref[0] = x6


def net_forward(x, kparams):
    """x: (N, 3, H, W) NCHW float32 -> (N, 3, H, W)."""
    n, c, h, w = x.shape
    x0 = x.reshape(n, c * h, w)                            # (ci, iy) folded to rows

    def const_spec(arr):
        if arr.ndim == 2:
            return pl.BlockSpec(arr.shape, lambda i: (0, 0))
        return pl.BlockSpec(arr.shape, lambda i: (0, 0, 0))

    # VMEM budget derived from actual operand bytes (constants + dbl-buffered IO).
    const_bytes = sum(int(np.prod(a.shape)) * 4 for a in kparams)
    io_bytes = 4 * (c * h * w) * 4
    vmem_limit = int(min(96 * 2 ** 20, max(4 * 2 ** 20, 4 * (const_bytes + io_bytes))))

    out = pl.pallas_call(
        _fused_net_kernel,
        out_shape=jax.ShapeDtypeStruct((n, c * h, w), jnp.float32),
        grid=(n,),
        in_specs=[pl.BlockSpec((1, c * h, w), lambda i: (i, 0, 0))] +
                 [const_spec(a) for a in kparams],
        out_specs=pl.BlockSpec((1, c * h, w), lambda i: (i, 0, 0)),
        compiler_params=pltpu.CompilerParams(
            dimension_semantics=("parallel",),        # batch over both v7x TCs
            vmem_limit_bytes=vmem_limit),
    )(x0, *kparams)
    return out.reshape(n, c, h, w)


# ------------------- host-side operand construction ------------------------ #

def _conv_stage1(wt, h, ho, stride, pad):
    """Conv2d weight fused with the row (H) gather: (k*Cout*Ho, Cin*H), kw-major."""
    cout, cin, k, _ = wt.shape
    a = np.zeros((k, cout * ho, cin * h), np.float32)
    for kw in range(k):
        for kh in range(k):
            for oy in range(ho):
                iy = oy * stride + kh - pad
                if 0 <= iy < h:
                    for co in range(cout):
                        for ci in range(cin):
                            a[kw, co * ho + oy, ci * h + iy] = wt[co, ci, kh, kw]
    return a.reshape(k * cout * ho, cin * h)


def _deconv_stage1(wt, h, ho, stride, pad):
    """ConvTranspose2d weight fused with the row (H) scatter: (k*Cout*Ho, Cin*H)."""
    cin, cout, k, _ = wt.shape
    a = np.zeros((k, cout * ho, cin * h), np.float32)
    for kw in range(k):
        for kh in range(k):
            for iy in range(h):
                oy = iy * stride - pad + kh
                if 0 <= oy < ho:
                    for co in range(cout):
                        for ci in range(cin):
                            a[kw, co * ho + oy, ci * h + iy] = wt[ci, co, kh, kw]
    return a.reshape(k * cout * ho, cin * h)


def _conv_stage2(w_in, w_out, k, stride, pad):
    """Per-tap 0/1 column (W) gather matrices for Conv2d: (k, W, Wo)."""
    c = np.zeros((k, w_in, w_out), np.float32)
    for kw in range(k):
        for ox in range(w_out):
            ix = ox * stride + kw - pad
            if 0 <= ix < w_in:
                c[kw, ix, ox] = 1.0
    return c


def _deconv_stage2(w_in, w_out, k, stride, pad):
    """Per-tap 0/1 column (W) scatter matrices for ConvTranspose2d: (k, W, Wo)."""
    c = np.zeros((k, w_in, w_out), np.float32)
    for kw in range(k):
        for ix in range(w_in):
            ox = ix * stride - pad + kw
            if 0 <= ox < w_out:
                c[kw, ix, ox] = 1.0
    return c


def prepare_kernel_params(params, height, width):
    p = {k: np.asarray(v, np.float32) for k, v in params.items()}

    def conv_out(x):
        return (x + 2 * 1 - 3) // 2 + 1        # k=3, s=2, p=1

    def deconv_out(x):
        return (x - 1) * 2 - 2 * 1 + 4         # k=4, s=2, p=1

    h, w = [height], [width]
    for _ in range(3):
        h.append(conv_out(h[-1])); w.append(conv_out(w[-1]))
    for _ in range(3):
        h.append(deconv_out(h[-1])); w.append(deconv_out(w[-1]))
    # for 16x16 input: h == w == [16, 8, 4, 2, 4, 8, 16]

    def bias_col(b, ho):
        return np.repeat(np.asarray(b, np.float32), ho)[:, None]

    kp = [
        _conv_stage1(p["conv1_w"], h[0], h[1], 2, 1),
        _conv_stage2(w[0], w[1], 3, 2, 1),
        bias_col(p["conv1_b"], h[1]),

        _conv_stage1(p["conv2_w"], h[1], h[2], 2, 1),
        _conv_stage2(w[1], w[2], 3, 2, 1),
        bias_col(p["conv2_b"], h[2]),

        _conv_stage1(p["conv3_w"], h[2], h[3], 2, 1),
        _conv_stage2(w[2], w[3], 3, 2, 1),
        bias_col(p["conv3_b"], h[3]),

        _deconv_stage1(p["deconv1_w"], h[3], h[4], 2, 1),
        _deconv_stage2(w[3], w[4], 4, 2, 1),
        bias_col(p["deconv1_b"], h[4]),

        # deconv2 input = concat(x4, x2): split the Cin axis -> split-K GEMMs.
        _deconv_stage1(p["deconv2_w"][:8], h[4], h[5], 2, 1),
        _deconv_stage1(p["deconv2_w"][8:], h[2], h[5], 2, 1),
        _deconv_stage2(w[4], w[5], 4, 2, 1),
        bias_col(p["deconv2_b"], h[5]),

        # deconv3 input = concat(x5, x1): split the Cin axis -> split-K GEMMs.
        _deconv_stage1(p["deconv3_w"][:4], h[5], h[6], 2, 1),
        _deconv_stage1(p["deconv3_w"][4:], h[1], h[6], 2, 1),
        _deconv_stage2(w[5], w[6], 4, 2, 1),
        bias_col(p["deconv3_b"], h[6]),
    ]
    return tuple(jnp.asarray(a) for a in kp)


# ------------------------------ parameters --------------------------------- #

def _uniform(key, shape, fan_in):
    bound = 1.0 / float(fan_in) ** 0.5
    return jax.random.uniform(key, shape, jnp.float32, -bound, bound)


def init_params(key):
    keys = jax.random.split(key, 12)
    p = {}
    # Conv2d weights: (Cout, Cin, k, k), fan_in = Cin*k*k
    p["conv1_w"] = _uniform(keys[0], (4, 3, 3, 3), 3 * 9)
    p["conv1_b"] = _uniform(keys[1], (4,), 3 * 9)
    p["conv2_w"] = _uniform(keys[2], (8, 4, 3, 3), 4 * 9)
    p["conv2_b"] = _uniform(keys[3], (8,), 4 * 9)
    p["conv3_w"] = _uniform(keys[4], (16, 8, 3, 3), 8 * 9)
    p["conv3_b"] = _uniform(keys[5], (16,), 8 * 9)
    # ConvTranspose2d weights: (Cin, Cout, k, k), fan_in = Cout*k*k (PyTorch)
    p["deconv1_w"] = _uniform(keys[6], (16, 8, 4, 4), 8 * 16)
    p["deconv1_b"] = _uniform(keys[7], (8,), 8 * 16)
    p["deconv2_w"] = _uniform(keys[8], (16, 4, 4, 4), 4 * 16)
    p["deconv2_b"] = _uniform(keys[9], (4,), 4 * 16)
    p["deconv3_w"] = _uniform(keys[10], (8, 3, 4, 4), 3 * 16)
    p["deconv3_b"] = _uniform(keys[11], (3,), 3 * 16)
    return p


# --------------------------- pure-JAX reference ----------------------------- #

def _ref_conv(x, w, b, stride, pad):
    out = lax.conv_general_dilated(
        x, w, window_strides=(stride, stride),
        padding=((pad, pad), (pad, pad)),
        dimension_numbers=("NCHW", "OIHW", "NCHW"))
    return out + b[None, :, None, None]


def _ref_deconv(x, w, b, stride, pad):
    k = w.shape[2]
    w_flip = jnp.flip(w, (2, 3)).transpose(1, 0, 2, 3)       # (Cout, Cin, k, k)
    q = k - 1 - pad
    out = lax.conv_general_dilated(
        x, w_flip, window_strides=(1, 1),
        padding=((q, q), (q, q)), lhs_dilation=(stride, stride),
        dimension_numbers=("NCHW", "OIHW", "NCHW"))
    return out + b[None, :, None, None]


def net_reference(params, x):
    x1 = jnp.maximum(_ref_conv(x, params["conv1_w"], params["conv1_b"], 2, 1), 0.0)
    x2 = jnp.maximum(_ref_conv(x1, params["conv2_w"], params["conv2_b"], 2, 1), 0.0)
    x3 = jnp.maximum(_ref_conv(x2, params["conv3_w"], params["conv3_b"], 2, 1), 0.0)
    x4 = jnp.maximum(_ref_deconv(x3, params["deconv1_w"], params["deconv1_b"], 2, 1), 0.0)
    x5 = jnp.maximum(_ref_deconv(jnp.concatenate([x4, x2], axis=1),
                                 params["deconv2_w"], params["deconv2_b"], 2, 1), 0.0)
    x6 = _ref_deconv(jnp.concatenate([x5, x1], axis=1),
                     params["deconv3_w"], params["deconv3_b"], 2, 1)
    return x6


# ---------------------------------- main ------------------------------------ #

if __name__ == "__main__":
    key = jax.random.PRNGKey(0)
    pkey, xkey = jax.random.split(key)
    params = init_params(pkey)

    # Input in NCHW like PyTorch: (batch=2, channels=3, 16, 16)
    x = jax.random.normal(xkey, (2, 3, 16, 16), jnp.float32)

    kparams = prepare_kernel_params(params, 16, 16)
    out = jax.block_until_ready(jax.jit(net_forward)(x, kparams))

    assert out.shape == (2, 3, 16, 16), out.shape
    assert bool(jnp.all(jnp.isfinite(out)))

    # Cross-check against a plain-JAX (XLA conv) reference of the same module.
    ref = jax.block_until_ready(jax.jit(net_reference)(params, x))
    err = float(jnp.max(jnp.abs(out - ref)))
    tol = 5e-2 * max(1.0, float(jnp.max(jnp.abs(ref))))
    assert err < tol, f"kernel/reference mismatch: max abs err {err} (tol {tol})"

    print("KERNEL_OK")
</pallas_src>

<mosaic_0001>
module attributes {stable_mosaic.version = 11 : i64} {
  func.func @_fused_net_kernel(%arg0: i32, %arg1: memref<1x48x16xf32, #tpu.memory_space<vmem>>, %arg2: memref<96x48xf32, #tpu.memory_space<vmem>>, %arg3: memref<3x16x8xf32, #tpu.memory_space<vmem>>, %arg4: memref<32x1xf32, #tpu.memory_space<vmem>>, %arg5: memref<96x32xf32, #tpu.memory_space<vmem>>, %arg6: memref<3x8x4xf32, #tpu.memory_space<vmem>>, %arg7: memref<32x1xf32, #tpu.memory_space<vmem>>, %arg8: memref<96x32xf32, #tpu.memory_space<vmem>>, %arg9: memref<3x4x2xf32, #tpu.memory_space<vmem>>, %arg10: memref<32x1xf32, #tpu.memory_space<vmem>>, %arg11: memref<128x32xf32, #tpu.memory_space<vmem>>, %arg12: memref<4x2x4xf32, #tpu.memory_space<vmem>>, %arg13: memref<32x1xf32, #tpu.memory_space<vmem>>, %arg14: memref<128x32xf32, #tpu.memory_space<vmem>>, %arg15: memref<128x32xf32, #tpu.memory_space<vmem>>, %arg16: memref<4x4x8xf32, #tpu.memory_space<vmem>>, %arg17: memref<32x1xf32, #tpu.memory_space<vmem>>, %arg18: memref<192x32xf32, #tpu.memory_space<vmem>>, %arg19: memref<192x32xf32, #tpu.memory_space<vmem>>, %arg20: memref<4x8x16xf32, #tpu.memory_space<vmem>>, %arg21: memref<48x1xf32, #tpu.memory_space<vmem>>, %arg22: memref<1x48x16xf32, #tpu.memory_space<vmem>>) attributes {dimension_semantics = [#tpu.dimension_semantics<parallel>], iteration_bounds = array<i64: 2>, scalar_prefetch = 0 : i64, scratch_operands = 0 : i64, tpu.core_type = #tpu.core_type<tc>, window_params = [{transform_indices = @transform_0, window_bounds = array<i64: 1, 48, 16>}, {pipeline_mode = #tpu.pipeline_mode<synchronous>, transform_indices = @transform_1, window_bounds = array<i64: 96, 48>}, {pipeline_mode = #tpu.pipeline_mode<synchronous>, transform_indices = @transform_2, window_bounds = array<i64: 3, 16, 8>}, {pipeline_mode = #tpu.pipeline_mode<synchronous>, transform_indices = @transform_3, window_bounds = array<i64: 32, 1>}, {pipeline_mode = #tpu.pipeline_mode<synchronous>, transform_indices = @transform_4, window_bounds = array<i64: 96, 32>}, {pipeline_mode = #tpu.pipeline_mode<synchronous>, transform_indices = @transform_5, window_bounds = array<i64: 3, 8, 4>}, {pipeline_mode = #tpu.pipeline_mode<synchronous>, transform_indices = @transform_6, window_bounds = array<i64: 32, 1>}, {pipeline_mode = #tpu.pipeline_mode<synchronous>, transform_indices = @transform_7, window_bounds = array<i64: 96, 32>}, {pipeline_mode = #tpu.pipeline_mode<synchronous>, transform_indices = @transform_8, window_bounds = array<i64: 3, 4, 2>}, {pipeline_mode = #tpu.pipeline_mode<synchronous>, transform_indices = @transform_9, window_bounds = array<i64: 32, 1>}, {pipeline_mode = #tpu.pipeline_mode<synchronous>, transform_indices = @transform_10, window_bounds = array<i64: 128, 32>}, {pipeline_mode = #tpu.pipeline_mode<synchronous>, transform_indices = @transform_11, window_bounds = array<i64: 4, 2, 4>}, {pipeline_mode = #tpu.pipeline_mode<synchronous>, transform_indices = @transform_12, window_bounds = array<i64: 32, 1>}, {pipeline_mode = #tpu.pipeline_mode<synchronous>, transform_indices = @transform_13, window_bounds = array<i64: 128, 32>}, {pipeline_mode = #tpu.pipeline_mode<synchronous>, transform_indices = @transform_14, window_bounds = array<i64: 128, 32>}, {pipeline_mode = #tpu.pipeline_mode<synchronous>, transform_indices = @transform_15, window_bounds = array<i64: 4, 4, 8>}, {pipeline_mode = #tpu.pipeline_mode<synchronous>, transform_indices = @transform_16, window_bounds = array<i64: 32, 1>}, {pipeline_mode = #tpu.pipeline_mode<synchronous>, transform_indices = @transform_17, window_bounds = array<i64: 192, 32>}, {pipeline_mode = #tpu.pipeline_mode<synchronous>, transform_indices = @transform_18, window_bounds = array<i64: 192, 32>}, {pipeline_mode = #tpu.pipeline_mode<synchronous>, transform_indices = @transform_19, window_bounds = array<i64: 4, 8, 16>}, {pipeline_mode = #tpu.pipeline_mode<synchronous>, transform_indices = @transform_20, window_bounds = array<i64: 48, 1>}, {transform_indices = @transform_21, window_bounds = array<i64: 1, 48, 16>}]} {
    %c0 = arith.constant 0 : index
    %c0_0 = arith.constant 0 : index
    %c0_1 = arith.constant 0 : index
    %0 = vector.load %arg1[%c0, %c0_0, %c0_1] : memref<1x48x16xf32, #tpu.memory_space<vmem>>, vector<1x48x16xf32>
    %1 = vector.shape_cast %0 : vector<1x48x16xf32> to vector<48x16xf32>
    %c0_2 = arith.constant 0 : index
    %c0_3 = arith.constant 0 : index
    %2 = vector.load %arg2[%c0_2, %c0_3] : memref<96x48xf32, #tpu.memory_space<vmem>>, vector<96x48xf32>
    %cst = arith.constant dense<0.000000e+00> : vector<96x16xf32>
    %3 = tpu.matmul %2, %1, %cst {dimension_numbers = #tpu.dot_dimension_numbers<[1], [0], [0], [1], [0, 0, 1, 1], [], []>} : vector<96x48xf32>, vector<48x16xf32>, vector<96x16xf32> -> vector<96x16xf32>
    %c0_4 = arith.constant 0 : index
    %c0_5 = arith.constant 0 : index
    %4 = vector.load %arg4[%c0_4, %c0_5] : memref<32x1xf32, #tpu.memory_space<vmem>>, vector<32x1xf32>
    %5 = vector.extract_strided_slice %3 {offsets = [0, 0], sizes = [32, 16], strides = [1, 1]} : vector<96x16xf32> to vector<32x16xf32>
    %c0_6 = arith.constant 0 : index
    %c0_7 = arith.constant 0 : index
    %c0_8 = arith.constant 0 : index
    %6 = vector.load %arg3[%c0_6, %c0_7, %c0_8] : memref<3x16x8xf32, #tpu.memory_space<vmem>>, vector<1x16x8xf32>
    %7 = vector.shape_cast %6 : vector<1x16x8xf32> to vector<16x8xf32>
    %cst_9 = arith.constant dense<0.000000e+00> : vector<32x8xf32>
    %8 = tpu.matmul %5, %7, %cst_9 {dimension_numbers = #tpu.dot_dimension_numbers<[1], [0], [0], [1], [0, 0, 1, 1], [], []>} : vector<32x16xf32>, vector<16x8xf32>, vector<32x8xf32> -> vector<32x8xf32>
    %9 = vector.broadcast %4 : vector<32x1xf32> to vector<32x8xf32>
    %10 = arith.addf %9, %8 : vector<32x8xf32>
    %11 = vector.extract_strided_slice %3 {offsets = [32, 0], sizes = [32, 16], strides = [1, 1]} : vector<96x16xf32> to vector<32x16xf32>
    %c1 = arith.constant 1 : index
    %c0_10 = arith.constant 0 : index
    %c0_11 = arith.constant 0 : index
    %12 = vector.load %arg3[%c1, %c0_10, %c0_11] : memref<3x16x8xf32, #tpu.memory_space<vmem>>, vector<1x16x8xf32>
    %13 = vector.shape_cast %12 : vector<1x16x8xf32> to vector<16x8xf32>
    %cst_12 = arith.constant dense<0.000000e+00> : vector<32x8xf32>
    %14 = tpu.matmul %11, %13, %cst_12 {dimension_numbers = #tpu.dot_dimension_numbers<[1], [0], [0], [1], [0, 0, 1, 1], [], []>} : vector<32x16xf32>, vector<16x8xf32>, vector<32x8xf32> -> vector<32x8xf32>
    %15 = arith.addf %10, %14 : vector<32x8xf32>
    %16 = vector.extract_strided_slice %3 {offsets = [64, 0], sizes = [32, 16], strides = [1, 1]} : vector<96x16xf32> to vector<32x16xf32>
    %c2 = arith.constant 2 : index
    %c0_13 = arith.constant 0 : index
    %c0_14 = arith.constant 0 : index
    %17 = vector.load %arg3[%c2, %c0_13, %c0_14] : memref<3x16x8xf32, #tpu.memory_space<vmem>>, vector<1x16x8xf32>
    %18 = vector.shape_cast %17 : vector<1x16x8xf32> to vector<16x8xf32>
    %cst_15 = arith.constant dense<0.000000e+00> : vector<32x8xf32>
    %19 = tpu.matmul %16, %18, %cst_15 {dimension_numbers = #tpu.dot_dimension_numbers<[1], [0], [0], [1], [0, 0, 1, 1], [], []>} : vector<32x16xf32>, vector<16x8xf32>, vector<32x8xf32> -> vector<32x8xf32>
    %20 = arith.addf %15, %19 : vector<32x8xf32>
    %cst_16 = arith.constant 0.000000e+00 : f32
    %21 = vector.broadcast %cst_16 : f32 to vector<32x8xf32>
    %22 = arith.maximumf %20, %21 : vector<32x8xf32>
    %c0_17 = arith.constant 0 : index
    %c0_18 = arith.constant 0 : index
    %23 = vector.load %arg5[%c0_17, %c0_18] : memref<96x32xf32, #tpu.memory_space<vmem>>, vector<96x32xf32>
    %cst_19 = arith.constant dense<0.000000e+00> : vector<96x8xf32>
    %24 = tpu.matmul %23, %22, %cst_19 {dimension_numbers = #tpu.dot_dimension_numbers<[1], [0], [0], [1], [0, 0, 1, 1], [], []>} : vector<96x32xf32>, vector<32x8xf32>, vector<96x8xf32> -> vector<96x8xf32>
    %c0_20 = arith.constant 0 : index
    %c0_21 = arith.constant 0 : index
    %25 = vector.load %arg7[%c0_20, %c0_21] : memref<32x1xf32, #tpu.memory_space<vmem>>, vector<32x1xf32>
    %26 = vector.extract_strided_slice %24 {offsets = [0, 0], sizes = [32, 8], strides = [1, 1]} : vector<96x8xf32> to vector<32x8xf32>
    %c0_22 = arith.constant 0 : index
    %c0_23 = arith.constant 0 : index
    %c0_24 = arith.constant 0 : index
    %27 = vector.load %arg6[%c0_22, %c0_23, %c0_24] : memref<3x8x4xf32, #tpu.memory_space<vmem>>, vector<1x8x4xf32>
    %28 = vector.shape_cast %27 : vector<1x8x4xf32> to vector<8x4xf32>
    %cst_25 = arith.constant dense<0.000000e+00> : vector<32x4xf32>
    %29 = tpu.matmul %26, %28, %cst_25 {dimension_numbers = #tpu.dot_dimension_numbers<[1], [0], [0], [1], [0, 0, 1, 1], [], []>} : vector<32x8xf32>, vector<8x4xf32>, vector<32x4xf32> -> vector<32x4xf32>
    %30 = vector.broadcast %25 : vector<32x1xf32> to vector<32x4xf32>
    %31 = arith.addf %30, %29 : vector<32x4xf32>
    %32 = vector.extract_strided_slice %24 {offsets = [32, 0], sizes = [32, 8], strides = [1, 1]} : vector<96x8xf32> to vector<32x8xf32>
    %c1_26 = arith.constant 1 : index
    %c0_27 = arith.constant 0 : index
    %c0_28 = arith.constant 0 : index
    %33 = vector.load %arg6[%c1_26, %c0_27, %c0_28] : memref<3x8x4xf32, #tpu.memory_space<vmem>>, vector<1x8x4xf32>
    %34 = vector.shape_cast %33 : vector<1x8x4xf32> to vector<8x4xf32>
    %cst_29 = arith.constant dense<0.000000e+00> : vector<32x4xf32>
    %35 = tpu.matmul %32, %34, %cst_29 {dimension_numbers = #tpu.dot_dimension_numbers<[1], [0], [0], [1], [0, 0, 1, 1], [], []>} : vector<32x8xf32>, vector<8x4xf32>, vector<32x4xf32> -> vector<32x4xf32>
    %36 = arith.addf %31, %35 : vector<32x4xf32>
    %37 = vector.extract_strided_slice %24 {offsets = [64, 0], sizes = [32, 8], strides = [1, 1]} : vector<96x8xf32> to vector<32x8xf32>
    %c2_30 = arith.constant 2 : index
    %c0_31 = arith.constant 0 : index
    %c0_32 = arith.constant 0 : index
    %38 = vector.load %arg6[%c2_30, %c0_31, %c0_32] : memref<3x8x4xf32, #tpu.memory_space<vmem>>, vector<1x8x4xf32>
    %39 = vector.shape_cast %38 : vector<1x8x4xf32> to vector<8x4xf32>
    %cst_33 = arith.constant dense<0.000000e+00> : vector<32x4xf32>
    %40 = tpu.matmul %37, %39, %cst_33 {dimension_numbers = #tpu.dot_dimension_numbers<[1], [0], [0], [1], [0, 0, 1, 1], [], []>} : vector<32x8xf32>, vector<8x4xf32>, vector<32x4xf32> -> vector<32x4xf32>
    %41 = arith.addf %36, %40 : vector<32x4xf32>
    %cst_34 = arith.constant 0.000000e+00 : f32
    %42 = vector.broadcast %cst_34 : f32 to vector<32x4xf32>
    %43 = arith.maximumf %41, %42 : vector<32x4xf32>
    %c0_35 = arith.constant 0 : index
    %c0_36 = arith.constant 0 : index
    %44 = vector.load %arg8[%c0_35, %c0_36] : memref<96x32xf32, #tpu.memory_space<vmem>>, vector<96x32xf32>
    %cst_37 = arith.constant dense<0.000000e+00> : vector<96x4xf32>
    %45 = tpu.matmul %44, %43, %cst_37 {dimension_numbers = #tpu.dot_dimension_numbers<[1], [0], [0], [1], [0, 0, 1, 1], [], []>} : vector<96x32xf32>, vector<32x4xf32>, vector<96x4xf32> -> vector<96x4xf32>
    %c0_38 = arith.constant 0 : index
    %c0_39 = arith.constant 0 : index
    %46 = vector.load %arg10[%c0_38, %c0_39] : memref<32x1xf32, #tpu.memory_space<vmem>>, vector<32x1xf32>
    %47 = vector.extract_strided_slice %45 {offsets = [0, 0], sizes = [32, 4], strides = [1, 1]} : vector<96x4xf32> to vector<32x4xf32>
    %c0_40 = arith.constant 0 : index
    %c0_41 = arith.constant 0 : index
    %c0_42 = arith.constant 0 : index
    %48 = vector.load %arg9[%c0_40, %c0_41, %c0_42] : memref<3x4x2xf32, #tpu.memory_space<vmem>>, vector<1x4x2xf32>
    %49 = vector.shape_cast %48 : vector<1x4x2xf32> to vector<4x2xf32>
    %cst_43 = arith.constant dense<0.000000e+00> : vector<32x2xf32>
    %50 = tpu.matmul %47, %49, %cst_43 {dimension_numbers = #tpu.dot_dimension_numbers<[1], [0], [0], [1], [0, 0, 1, 1], [], []>} : vector<32x4xf32>, vector<4x2xf32>, vector<32x2xf32> -> vector<32x2xf32>
    %51 = vector.broadcast %46 : vector<32x1xf32> to vector<32x2xf32>
    %52 = arith.addf %51, %50 : vector<32x2xf32>
    %53 = vector.extract_strided_slice %45 {offsets = [32, 0], sizes = [32, 4], strides = [1, 1]} : vector<96x4xf32> to vector<32x4xf32>
    %c1_44 = arith.constant 1 : index
    %c0_45 = arith.constant 0 : index
    %c0_46 = arith.constant 0 : index
    %54 = vector.load %arg9[%c1_44, %c0_45, %c0_46] : memref<3x4x2xf32, #tpu.memory_space<vmem>>, vector<1x4x2xf32>
    %55 = vector.shape_cast %54 : vector<1x4x2xf32> to vector<4x2xf32>
    %cst_47 = arith.constant dense<0.000000e+00> : vector<32x2xf32>
    %56 = tpu.matmul %53, %55, %cst_47 {dimension_numbers = #tpu.dot_dimension_numbers<[1], [0], [0], [1], [0, 0, 1, 1], [], []>} : vector<32x4xf32>, vector<4x2xf32>, vector<32x2xf32> -> vector<32x2xf32>
    %57 = arith.addf %52, %56 : vector<32x2xf32>
    %58 = vector.extract_strided_slice %45 {offsets = [64, 0], sizes = [32, 4], strides = [1, 1]} : vector<96x4xf32> to vector<32x4xf32>
    %c2_48 = arith.constant 2 : index
    %c0_49 = arith.constant 0 : index
    %c0_50 = arith.constant 0 : index
    %59 = vector.load %arg9[%c2_48, %c0_49, %c0_50] : memref<3x4x2xf32, #tpu.memory_space<vmem>>, vector<1x4x2xf32>
    %60 = vector.shape_cast %59 : vector<1x4x2xf32> to vector<4x2xf32>
    %cst_51 = arith.constant dense<0.000000e+00> : vector<32x2xf32>
    %61 = tpu.matmul %58, %60, %cst_51 {dimension_numbers = #tpu.dot_dimension_numbers<[1], [0], [0], [1], [0, 0, 1, 1], [], []>} : vector<32x4xf32>, vector<4x2xf32>, vector<32x2xf32> -> vector<32x2xf32>
    %62 = arith.addf %57, %61 : vector<32x2xf32>
    %cst_52 = arith.constant 0.000000e+00 : f32
    %63 = vector.broadcast %cst_52 : f32 to vector<32x2xf32>
    %64 = arith.maximumf %62, %63 : vector<32x2xf32>
    %c0_53 = arith.constant 0 : index
    %c0_54 = arith.constant 0 : index
    %65 = vector.load %arg11[%c0_53, %c0_54] : memref<128x32xf32, #tpu.memory_space<vmem>>, vector<128x32xf32>
    %cst_55 = arith.constant dense<0.000000e+00> : vector<128x2xf32>
    %66 = tpu.matmul %65, %64, %cst_55 {dimension_numbers = #tpu.dot_dimension_numbers<[1], [0], [0], [1], [0, 0, 1, 1], [], []>} : vector<128x32xf32>, vector<32x2xf32>, vector<128x2xf32> -> vector<128x2xf32>
    %c0_56 = arith.constant 0 : index
    %c0_57 = arith.constant 0 : index
    %67 = vector.load %arg13[%c0_56, %c0_57] : memref<32x1xf32, #tpu.memory_space<vmem>>, vector<32x1xf32>
    %68 = vector.extract_strided_slice %66 {offsets = [0, 0], sizes = [32, 2], strides = [1, 1]} : vector<128x2xf32> to vector<32x2xf32>
    %c0_58 = arith.constant 0 : index
    %c0_59 = arith.constant 0 : index
    %c0_60 = arith.constant 0 : index
    %69 = vector.load %arg12[%c0_58, %c0_59, %c0_60] : memref<4x2x4xf32, #tpu.memory_space<vmem>>, vector<1x2x4xf32>
    %70 = vector.shape_cast %69 : vector<1x2x4xf32> to vector<2x4xf32>
    %cst_61 = arith.constant dense<0.000000e+00> : vector<32x4xf32>
    %71 = tpu.matmul %68, %70, %cst_61 {dimension_numbers = #tpu.dot_dimension_numbers<[1], [0], [0], [1], [0, 0, 1, 1], [], []>} : vector<32x2xf32>, vector<2x4xf32>, vector<32x4xf32> -> vector<32x4xf32>
    %72 = vector.broadcast %67 : vector<32x1xf32> to vector<32x4xf32>
    %73 = arith.addf %72, %71 : vector<32x4xf32>
    %74 = vector.extract_strided_slice %66 {offsets = [32, 0], sizes = [32, 2], strides = [1, 1]} : vector<128x2xf32> to vector<32x2xf32>
    %c1_62 = arith.constant 1 : index
    %c0_63 = arith.constant 0 : index
    %c0_64 = arith.constant 0 : index
    %75 = vector.load %arg12[%c1_62, %c0_63, %c0_64] : memref<4x2x4xf32, #tpu.memory_space<vmem>>, vector<1x2x4xf32>
    %76 = vector.shape_cast %75 : vector<1x2x4xf32> to vector<2x4xf32>
    %cst_65 = arith.constant dense<0.000000e+00> : vector<32x4xf32>
    %77 = tpu.matmul %74, %76, %cst_65 {dimension_numbers = #tpu.dot_dimension_numbers<[1], [0], [0], [1], [0, 0, 1, 1], [], []>} : vector<32x2xf32>, vector<2x4xf32>, vector<32x4xf32> -> vector<32x4xf32>
    %78 = arith.addf %73, %77 : vector<32x4xf32>
    %79 = vector.extract_strided_slice %66 {offsets = [64, 0], sizes = [32, 2], strides = [1, 1]} : vector<128x2xf32> to vector<32x2xf32>
    %c2_66 = arith.constant 2 : index
    %c0_67 = arith.constant 0 : index
    %c0_68 = arith.constant 0 : index
    %80 = vector.load %arg12[%c2_66, %c0_67, %c0_68] : memref<4x2x4xf32, #tpu.memory_space<vmem>>, vector<1x2x4xf32>
    %81 = vector.shape_cast %80 : vector<1x2x4xf32> to vector<2x4xf32>
    %cst_69 = arith.constant dense<0.000000e+00> : vector<32x4xf32>
    %82 = tpu.matmul %79, %81, %cst_69 {dimension_numbers = #tpu.dot_dimension_numbers<[1], [0], [0], [1], [0, 0, 1, 1], [], []>} : vector<32x2xf32>, vector<2x4xf32>, vector<32x4xf32> -> vector<32x4xf32>
    %83 = arith.addf %78, %82 : vector<32x4xf32>
    %84 = vector.extract_strided_slice %66 {offsets = [96, 0], sizes = [32, 2], strides = [1, 1]} : vector<128x2xf32> to vector<32x2xf32>
    %c3 = arith.constant 3 : index
    %c0_70 = arith.constant 0 : index
    %c0_71 = arith.constant 0 : index
    %85 = vector.load %arg12[%c3, %c0_70, %c0_71] : memref<4x2x4xf32, #tpu.memory_space<vmem>>, vector<1x2x4xf32>
    %86 = vector.shape_cast %85 : vector<1x2x4xf32> to vector<2x4xf32>
    %cst_72 = arith.constant dense<0.000000e+00> : vector<32x4xf32>
    %87 = tpu.matmul %84, %86, %cst_72 {dimension_numbers = #tpu.dot_dimension_numbers<[1], [0], [0], [1], [0, 0, 1, 1], [], []>} : vector<32x2xf32>, vector<2x4xf32>, vector<32x4xf32> -> vector<32x4xf32>
    %88 = arith.addf %83, %87 : vector<32x4xf32>
    %cst_73 = arith.constant 0.000000e+00 : f32
    %89 = vector.broadcast %cst_73 : f32 to vector<32x4xf32>
    %90 = arith.maximumf %88, %89 : vector<32x4xf32>
    %c0_74 = arith.constant 0 : index
    %c0_75 = arith.constant 0 : index
    %91 = vector.load %arg14[%c0_74, %c0_75] : memref<128x32xf32, #tpu.memory_space<vmem>>, vector<128x32xf32>
    %cst_76 = arith.constant dense<0.000000e+00> : vector<128x4xf32>
    %92 = tpu.matmul %91, %90, %cst_76 {dimension_numbers = #tpu.dot_dimension_numbers<[1], [0], [0], [1], [0, 0, 1, 1], [], []>} : vector<128x32xf32>, vector<32x4xf32>, vector<128x4xf32> -> vector<128x4xf32>
    %c0_77 = arith.constant 0 : index
    %c0_78 = arith.constant 0 : index
    %93 = vector.load %arg15[%c0_77, %c0_78] : memref<128x32xf32, #tpu.memory_space<vmem>>, vector<128x32xf32>
    %cst_79 = arith.constant dense<0.000000e+00> : vector<128x4xf32>
    %94 = tpu.matmul %93, %43, %cst_79 {dimension_numbers = #tpu.dot_dimension_numbers<[1], [0], [0], [1], [0, 0, 1, 1], [], []>} : vector<128x32xf32>, vector<32x4xf32>, vector<128x4xf32> -> vector<128x4xf32>
    %95 = arith.addf %92, %94 : vector<128x4xf32>
    %c0_80 = arith.constant 0 : index
    %c0_81 = arith.constant 0 : index
    %96 = vector.load %arg17[%c0_80, %c0_81] : memref<32x1xf32, #tpu.memory_space<vmem>>, vector<32x1xf32>
    %97 = vector.extract_strided_slice %95 {offsets = [0, 0], sizes = [32, 4], strides = [1, 1]} : vector<128x4xf32> to vector<32x4xf32>
    %c0_82 = arith.constant 0 : index
    %c0_83 = arith.constant 0 : index
    %c0_84 = arith.constant 0 : index
    %98 = vector.load %arg16[%c0_82, %c0_83, %c0_84] : memref<4x4x8xf32, #tpu.memory_space<vmem>>, vector<1x4x8xf32>
    %99 = vector.shape_cast %98 : vector<1x4x8xf32> to vector<4x8xf32>
    %cst_85 = arith.constant dense<0.000000e+00> : vector<32x8xf32>
    %100 = tpu.matmul %97, %99, %cst_85 {dimension_numbers = #tpu.dot_dimension_numbers<[1], [0], [0], [1], [0, 0, 1, 1], [], []>} : vector<32x4xf32>, vector<4x8xf32>, vector<32x8xf32> -> vector<32x8xf32>
    %101 = vector.broadcast %96 : vector<32x1xf32> to vector<32x8xf32>
    %102 = arith.addf %101, %100 : vector<32x8xf32>
    %103 = vector.extract_strided_slice %95 {offsets = [32, 0], sizes = [32, 4], strides = [1, 1]} : vector<128x4xf32> to vector<32x4xf32>
    %c1_86 = arith.constant 1 : index
    %c0_87 = arith.constant 0 : index
    %c0_88 = arith.constant 0 : index
    %104 = vector.load %arg16[%c1_86, %c0_87, %c0_88] : memref<4x4x8xf32, #tpu.memory_space<vmem>>, vector<1x4x8xf32>
    %105 = vector.shape_cast %104 : vector<1x4x8xf32> to vector<4x8xf32>
    %cst_89 = arith.constant dense<0.000000e+00> : vector<32x8xf32>
    %106 = tpu.matmul %103, %105, %cst_89 {dimension_numbers = #tpu.dot_dimension_numbers<[1], [0], [0], [1], [0, 0, 1, 1], [], []>} : vector<32x4xf32>, vector<4x8xf32>, vector<32x8xf32> -> vector<32x8xf32>
    %107 = arith.addf %102, %106 : vector<32x8xf32>
    %108 = vector.extract_strided_slice %95 {offsets = [64, 0], sizes = [32, 4], strides = [1, 1]} : vector<128x4xf32> to vector<32x4xf32>
    %c2_90 = arith.constant 2 : index
    %c0_91 = arith.constant 0 : index
    %c0_92 = arith.constant 0 : index
    %109 = vector.load %arg16[%c2_90, %c0_91, %c0_92] : memref<4x4x8xf32, #tpu.memory_space<vmem>>, vector<1x4x8xf32>
    %110 = vector.shape_cast %109 : vector<1x4x8xf32> to vector<4x8xf32>
    %cst_93 = arith.constant dense<0.000000e+00> : vector<32x8xf32>
    %111 = tpu.matmul %108, %110, %cst_93 {dimension_numbers = #tpu.dot_dimension_numbers<[1], [0], [0], [1], [0, 0, 1, 1], [], []>} : vector<32x4xf32>, vector<4x8xf32>, vector<32x8xf32> -> vector<32x8xf32>
    %112 = arith.addf %107, %111 : vector<32x8xf32>
    %113 = vector.extract_strided_slice %95 {offsets = [96, 0], sizes = [32, 4], strides = [1, 1]} : vector<128x4xf32> to vector<32x4xf32>
    %c3_94 = arith.constant 3 : index
    %c0_95 = arith.constant 0 : index
    %c0_96 = arith.constant 0 : index
    %114 = vector.load %arg16[%c3_94, %c0_95, %c0_96] : memref<4x4x8xf32, #tpu.memory_space<vmem>>, vector<1x4x8xf32>
    %115 = vector.shape_cast %114 : vector<1x4x8xf32> to vector<4x8xf32>
    %cst_97 = arith.constant dense<0.000000e+00> : vector<32x8xf32>
    %116 = tpu.matmul %113, %115, %cst_97 {dimension_numbers = #tpu.dot_dimension_numbers<[1], [0], [0], [1], [0, 0, 1, 1], [], []>} : vector<32x4xf32>, vector<4x8xf32>, vector<32x8xf32> -> vector<32x8xf32>
    %117 = arith.addf %112, %116 : vector<32x8xf32>
    %cst_98 = arith.constant 0.000000e+00 : f32
    %118 = vector.broadcast %cst_98 : f32 to vector<32x8xf32>
    %119 = arith.maximumf %117, %118 : vector<32x8xf32>
    %c0_99 = arith.constant 0 : index
    %c0_100 = arith.constant 0 : index
    %120 = vector.load %arg18[%c0_99, %c0_100] : memref<192x32xf32, #tpu.memory_space<vmem>>, vector<192x32xf32>
    %cst_101 = arith.constant dense<0.000000e+00> : vector<192x8xf32>
    %121 = tpu.matmul %120, %119, %cst_101 {dimension_numbers = #tpu.dot_dimension_numbers<[1], [0], [0], [1], [0, 0, 1, 1], [], []>} : vector<192x32xf32>, vector<32x8xf32>, vector<192x8xf32> -> vector<192x8xf32>
    %c0_102 = arith.constant 0 : index
    %c0_103 = arith.constant 0 : index
    %122 = vector.load %arg19[%c0_102, %c0_103] : memref<192x32xf32, #tpu.memory_space<vmem>>, vector<192x32xf32>
    %cst_104 = arith.constant dense<0.000000e+00> : vector<192x8xf32>
    %123 = tpu.matmul %122, %22, %cst_104 {dimension_numbers = #tpu.dot_dimension_numbers<[1], [0], [0], [1], [0, 0, 1, 1], [], []>} : vector<192x32xf32>, vector<32x8xf32>, vector<192x8xf32> -> vector<192x8xf32>
    %124 = arith.addf %121, %123 : vector<192x8xf32>
    %c0_105 = arith.constant 0 : index
    %c0_106 = arith.constant 0 : index
    %125 = vector.load %arg21[%c0_105, %c0_106] : memref<48x1xf32, #tpu.memory_space<vmem>>, vector<48x1xf32>
    %126 = vector.extract_strided_slice %124 {offsets = [0, 0], sizes = [48, 8], strides = [1, 1]} : vector<192x8xf32> to vector<48x8xf32>
    %c0_107 = arith.constant 0 : index
    %c0_108 = arith.constant 0 : index
    %c0_109 = arith.constant 0 : index
    %127 = vector.load %arg20[%c0_107, %c0_108, %c0_109] : memref<4x8x16xf32, #tpu.memory_space<vmem>>, vector<1x8x16xf32>
    %128 = vector.shape_cast %127 : vector<1x8x16xf32> to vector<8x16xf32>
    %cst_110 = arith.constant dense<0.000000e+00> : vector<48x16xf32>
    %129 = tpu.matmul %126, %128, %cst_110 {dimension_numbers = #tpu.dot_dimension_numbers<[1], [0], [0], [1], [0, 0, 1, 1], [], []>} : vector<48x8xf32>, vector<8x16xf32>, vector<48x16xf32> -> vector<48x16xf32>
    %130 = vector.broadcast %125 : vector<48x1xf32> to vector<48x16xf32>
    %131 = arith.addf %130, %129 : vector<48x16xf32>
    %132 = vector.extract_strided_slice %124 {offsets = [48, 0], sizes = [48, 8], strides = [1, 1]} : vector<192x8xf32> to vector<48x8xf32>
    %c1_111 = arith.constant 1 : index
    %c0_112 = arith.constant 0 : index
    %c0_113 = arith.constant 0 : index
    %133 = vector.load %arg20[%c1_111, %c0_112, %c0_113] : memref<4x8x16xf32, #tpu.memory_space<vmem>>, vector<1x8x16xf32>
    %134 = vector.shape_cast %133 : vector<1x8x16xf32> to vector<8x16xf32>
    %cst_114 = arith.constant dense<0.000000e+00> : vector<48x16xf32>
    %135 = tpu.matmul %132, %134, %cst_114 {dimension_numbers = #tpu.dot_dimension_numbers<[1], [0], [0], [1], [0, 0, 1, 1], [], []>} : vector<48x8xf32>, vector<8x16xf32>, vector<48x16xf32> -> vector<48x16xf32>
    %136 = arith.addf %131, %135 : vector<48x16xf32>
    %137 = vector.extract_strided_slice %124 {offsets = [96, 0], sizes = [48, 8], strides = [1, 1]} : vector<192x8xf32> to vector<48x8xf32>
    %c2_115 = arith.constant 2 : index
    %c0_116 = arith.constant 0 : index
    %c0_117 = arith.constant 0 : index
    %138 = vector.load %arg20[%c2_115, %c0_116, %c0_117] : memref<4x8x16xf32, #tpu.memory_space<vmem>>, vector<1x8x16xf32>
    %139 = vector.shape_cast %138 : vector<1x8x16xf32> to vector<8x16xf32>
    %cst_118 = arith.constant dense<0.000000e+00> : vector<48x16xf32>
    %140 = tpu.matmul %137, %139, %cst_118 {dimension_numbers = #tpu.dot_dimension_numbers<[1], [0], [0], [1], [0, 0, 1, 1], [], []>} : vector<48x8xf32>, vector<8x16xf32>, vector<48x16xf32> -> vector<48x16xf32>
    %141 = arith.addf %136, %140 : vector<48x16xf32>
    %142 = vector.extract_strided_slice %124 {offsets = [144, 0], sizes = [48, 8], strides = [1, 1]} : vector<192x8xf32> to vector<48x8xf32>
    %c3_119 = arith.constant 3 : index
    %c0_120 = arith.constant 0 : index
    %c0_121 = arith.constant 0 : index
    %143 = vector.load %arg20[%c3_119, %c0_120, %c0_121] : memref<4x8x16xf32, #tpu.memory_space<vmem>>, vector<1x8x16xf32>
    %144 = vector.shape_cast %143 : vector<1x8x16xf32> to vector<8x16xf32>
    %cst_122 = arith.constant dense<0.000000e+00> : vector<48x16xf32>
    %145 = tpu.matmul %142, %144, %cst_122 {dimension_numbers = #tpu.dot_dimension_numbers<[1], [0], [0], [1], [0, 0, 1, 1], [], []>} : vector<48x8xf32>, vector<8x16xf32>, vector<48x16xf32> -> vector<48x16xf32>
    %146 = arith.addf %141, %145 : vector<48x16xf32>
    %c0_123 = arith.constant 0 : index
    %c0_124 = arith.constant 0 : index
    %c0_125 = arith.constant 0 : index
    %147 = vector.load %arg22[%c0_123, %c0_124, %c0_125] : memref<1x48x16xf32, #tpu.memory_space<vmem>>, vector<1x48x16xf32>
    %148 = vector.shape_cast %147 : vector<1x48x16xf32> to vector<48x16xf32>
    %149 = vector.shape_cast %146 : vector<48x16xf32> to vector<1x48x16xf32>
    tpu.vector_store %arg22[%c0_123, %c0_124, %c0_125], %149 {strides = array<i32>} : memref<1x48x16xf32, #tpu.memory_space<vmem>>, vector<1x48x16xf32>,
    return
  }
  func.func @transform_0(%arg0: i32) -> (i32, i32, i32) {
    %c0_i32 = arith.constant 0 : i32
    %c0_i32_0 = arith.constant 0 : i32
    %c0_i32_1 = arith.constant 0 : i32
    return %arg0, %c0_i32, %c0_i32_0 : i32, i32, i32
  }
  func.func @transform_1(%arg0: i32) -> (i32, i32) {
    %c0_i32 = arith.constant 0 : i32
    %c0_i32_0 = arith.constant 0 : i32
    %c0_i32_1 = arith.constant 0 : i32
    return %c0_i32, %c0_i32_0 : i32, i32
  }
  func.func @transform_2(%arg0: i32) -> (i32, i32, i32) {
    %c0_i32 = arith.constant 0 : i32
    %c0_i32_0 = arith.constant 0 : i32
    %c0_i32_1 = arith.constant 0 : i32
    %c0_i32_2 = arith.constant 0 : i32
    return %c0_i32, %c0_i32_0, %c0_i32_1 : i32, i32, i32
  }
  func.func @transform_3(%arg0: i32) -> (i32, i32) {
    %c0_i32 = arith.constant 0 : i32
    %c0_i32_0 = arith.constant 0 : i32
    %c0_i32_1 = arith.constant 0 : i32
    return %c0_i32, %c0_i32_0 : i32, i32
  }
  func.func @transform_4(%arg0: i32) -> (i32, i32) {
    %c0_i32 = arith.constant 0 : i32
    %c0_i32_0 = arith.constant 0 : i32
    %c0_i32_1 = arith.constant 0 : i32
    return %c0_i32, %c0_i32_0 : i32, i32
  }
  func.func @transform_5(%arg0: i32) -> (i32, i32, i32) {
    %c0_i32 = arith.constant 0 : i32
    %c0_i32_0 = arith.constant 0 : i32
    %c0_i32_1 = arith.constant 0 : i32
    %c0_i32_2 = arith.constant 0 : i32
    return %c0_i32, %c0_i32_0, %c0_i32_1 : i32, i32, i32
  }
  func.func @transform_6(%arg0: i32) -> (i32, i32) {
    %c0_i32 = arith.constant 0 : i32
    %c0_i32_0 = arith.constant 0 : i32
    %c0_i32_1 = arith.constant 0 : i32
    return %c0_i32, %c0_i32_0 : i32, i32
  }
  func.func @transform_7(%arg0: i32) -> (i32, i32) {
    %c0_i32 = arith.constant 0 : i32
    %c0_i32_0 = arith.constant 0 : i32
    %c0_i32_1 = arith.constant 0 : i32
    return %c0_i32, %c0_i32_0 : i32, i32
  }
  func.func @transform_8(%arg0: i32) -> (i32, i32, i32) {
    %c0_i32 = arith.constant 0 : i32
    %c0_i32_0 = arith.constant 0 : i32
    %c0_i32_1 = arith.constant 0 : i32
    %c0_i32_2 = arith.constant 0 : i32
    return %c0_i32, %c0_i32_0, %c0_i32_1 : i32, i32, i32
  }
  func.func @transform_9(%arg0: i32) -> (i32, i32) {
    %c0_i32 = arith.constant 0 : i32
    %c0_i32_0 = arith.constant 0 : i32
    %c0_i32_1 = arith.constant 0 : i32
    return %c0_i32, %c0_i32_0 : i32, i32
  }
  func.func @transform_10(%arg0: i32) -> (i32, i32) {
    %c0_i32 = arith.constant 0 : i32
    %c0_i32_0 = arith.constant 0 : i32
    %c0_i32_1 = arith.constant 0 : i32
    return %c0_i32, %c0_i32_0 : i32, i32
  }
  func.func @transform_11(%arg0: i32) -> (i32, i32, i32) {
    %c0_i32 = arith.constant 0 : i32
    %c0_i32_0 = arith.constant 0 : i32
    %c0_i32_1 = arith.constant 0 : i32
    %c0_i32_2 = arith.constant 0 : i32
    return %c0_i32, %c0_i32_0, %c0_i32_1 : i32, i32, i32
  }
  func.func @transform_12(%arg0: i32) -> (i32, i32) {
    %c0_i32 = arith.constant 0 : i32
    %c0_i32_0 = arith.constant 0 : i32
    %c0_i32_1 = arith.constant 0 : i32
    return %c0_i32, %c0_i32_0 : i32, i32
  }
  func.func @transform_13(%arg0: i32) -> (i32, i32) {
    %c0_i32 = arith.constant 0 : i32
    %c0_i32_0 = arith.constant 0 : i32
    %c0_i32_1 = arith.constant 0 : i32
    return %c0_i32, %c0_i32_0 : i32, i32
  }
  func.func @transform_14(%arg0: i32) -> (i32, i32) {
    %c0_i32 = arith.constant 0 : i32
    %c0_i32_0 = arith.constant 0 : i32
    %c0_i32_1 = arith.constant 0 : i32
    return %c0_i32, %c0_i32_0 : i32, i32
  }
  func.func @transform_15(%arg0: i32) -> (i32, i32, i32) {
    %c0_i32 = arith.constant 0 : i32
    %c0_i32_0 = arith.constant 0 : i32
    %c0_i32_1 = arith.constant 0 : i32
    %c0_i32_2 = arith.constant 0 : i32
    return %c0_i32, %c0_i32_0, %c0_i32_1 : i32, i32, i32
  }
  func.func @transform_16(%arg0: i32) -> (i32, i32) {
    %c0_i32 = arith.constant 0 : i32
    %c0_i32_0 = arith.constant 0 : i32
    %c0_i32_1 = arith.constant 0 : i32
    return %c0_i32, %c0_i32_0 : i32, i32
  }
  func.func @transform_17(%arg0: i32) -> (i32, i32) {
    %c0_i32 = arith.constant 0 : i32
    %c0_i32_0 = arith.constant 0 : i32
    %c0_i32_1 = arith.constant 0 : i32
    return %c0_i32, %c0_i32_0 : i32, i32
  }
  func.func @transform_18(%arg0: i32) -> (i32, i32) {
    %c0_i32 = arith.constant 0 : i32
    %c0_i32_0 = arith.constant 0 : i32
    %c0_i32_1 = arith.constant 0 : i32
    return %c0_i32, %c0_i32_0 : i32, i32
  }
  func.func @transform_19(%arg0: i32) -> (i32, i32, i32) {
    %c0_i32 = arith.constant 0 : i32
    %c0_i32_0 = arith.constant 0 : i32
    %c0_i32_1 = arith.constant 0 : i32
    %c0_i32_2 = arith.constant 0 : i32
    return %c0_i32, %c0_i32_0, %c0_i32_1 : i32, i32, i32
  }
  func.func @transform_20(%arg0: i32) -> (i32, i32) {
    %c0_i32 = arith.constant 0 : i32
    %c0_i32_0 = arith.constant 0 : i32
    %c0_i32_1 = arith.constant 0 : i32
    return %c0_i32, %c0_i32_0 : i32, i32
  }
  func.func @transform_21(%arg0: i32) -> (i32, i32, i32) {
    %c0_i32 = arith.constant 0 : i32
    %c0_i32_0 = arith.constant 0 : i32
    %c0_i32_1 = arith.constant 0 : i32
    return %arg0, %c0_i32, %c0_i32_0 : i32, i32, i32
  }
}

</mosaic_0001>

<bundles_post_ra>
// kernel: net_forward.1
= control target key start
LH: loop header
LB: loop body
LE: loop exit
PB: predicated region body
PF: predicated region fallthrough
CT: control target
= control target key end

     0   :  { %s4478_s0 = inlined_call_operand.vmem [shape: f32[2,48,16], index: 0, kind: input, shape index: {}]   ;;  %s4479_s1 = inlined_call_operand.vmem [shape: f32[96,48], index: 1, kind: input, shape index: {}]   ;;  %s4480_s2 = inlined_call_operand.vmem [shape: f32[3,16,8], index: 2, kind: input, shape index: {}]   ;;  %s4481_s3 = inlined_call_operand.vmem [shape: f32[32,1], index: 3, kind: input, shape index: {}]   ;;  %s4482_s4 = inlined_call_operand.vmem [shape: f32[96,32], index: 4, kind: input, shape index: {}]   ;;  %s4483_s5 = inlined_call_operand.vmem [shape: f32[3,8,4], index: 5, kind: input, shape index: {}]   ;;  %s4484_s6 = inlined_call_operand.vmem [shape: f32[32,1], index: 6, kind: input, shape index: {}]   ;;  %s4485_s7 = inlined_call_operand.vmem [shape: f32[96,32], index: 7, kind: input, shape index: {}]   ;;  %s4486_s8 = inlined_call_operand.vmem [shape: f32[3,4,2], index: 8, kind: input, shape index: {}]   ;;  %s4487_s9 = inlined_call_operand.vmem [shape: f32[32,1], index: 9, kind: input, shape index: {}]   ;;  %s4488_s10 = inlined_call_operand.vmem [shape: f32[128,32], index: 10, kind: input, shape index: {}]   ;;  %s4489_s11 = inlined_call_operand.vmem [shape: f32[4,2,4], index: 11, kind: input, shape index: {}]   ;;  %s4490_s12 = inlined_call_operand.vmem [shape: f32[32,1], index: 12, kind: input, shape index: {}]   ;;  %s4491_s13 = inlined_call_operand.vmem [shape: f32[128,32], index: 13, kind: input, shape index: {}]   ;;  %s4492_s14 = inlined_call_operand.vmem [shape: f32[128,32], index: 14, kind: input, shape index: {}]   ;;  %s4493_s15 = inlined_call_operand.vmem [shape: f32[4,4,8], index: 15, kind: input, shape index: {}]   ;;  %s4494_s16 = inlined_call_operand.vmem [shape: f32[32,1], index: 16, kind: input, shape index: {}]   ;;  %s4495_s17 = inlined_call_operand.vmem [shape: f32[192,32], index: 17, kind: input, shape index: {}]   ;;  %s4496_s18 = inlined_call_operand.vmem [shape: f32[192,32], index: 18, kind: input, shape index: {}]   ;;  %s4497_s19 = inlined_call_operand.vmem [shape: f32[4,8,16], index: 19, kind: input, shape index: {}]   ;;  %s4498_s20 = inlined_call_operand.vmem [shape: f32[48,1], index: 20, kind: input, shape index: {}]   ;;  %s4499_s21 = inlined_call_operand.hbm [shape: f32[2,48,16], index: 21, kind: output, shape index: {}]  }
   0x1   :  { %4512 = sst [smem:[#allocation10_spill]] %s4478_s0 }
   0x2   :  { %4513 = sst [smem:[#allocation11_spill]] %s4479_s1 }
   0x3   :  { %4514 = sst [smem:[#allocation12_spill]] %s4480_s2 }
   0x4   :  { %4515 = sst [smem:[#allocation13_spill]] %s4481_s3 }
   0x5   :  { %4516 = sst [smem:[#allocation14_spill]] %s4482_s4 }
   0x6   :  { %4517 = sst [smem:[#allocation15_spill]] %s4483_s5 }
   0x7   :  { %4518 = sst [smem:[#allocation16_spill]] %s4484_s6 }
   0x8   :  { %4519 = sst [smem:[#allocation17_spill]] %s4485_s7 }
   0x9   :  { %4520 = sst [smem:[#allocation18_spill]] %s4486_s8 }
   0xa   :  { %4521 = sst [smem:[#allocation19_spill]] %s4487_s9 }
   0xb   :  { %4522 = sst [smem:[#allocation20_spill]] %s4488_s10 }
   0xc   :  { %26 = vsyncpa [#allocation3], 0 }
   0xd   :  { %28 = vsyncpa [#allocation3 + $0x1], 0  ;;  %s3553_s2 = smov 0   ;;  %s3555_s25 = smov 0  }
   0xe   :  { %s3557_s26 = smov 0   ;;  %s3559_s27 = smov 0  }
   0xf LB: > { %4523 = sst [smem:[#allocation5_spill]] %s3426_s2  ;;  %s3574_s3 = sadd.s32 4294967295, %s3438_s27   ;;  %s3438_s27 = sphi %s3559_s27, %s4544_s27   ;;  %s3434_s26 = sphi %s3557_s26, %s4546_s26   ;;  %s3430_s25 = sphi %s3555_s25, %s4548_s25   ;;  %s3426_s2 = sphi %s3553_s2, %s4547_s2  }
  0x10   : > { %4524 = sst [smem:[#allocation6_spill]] %s3434_s26  ;;  %s3062_s28 = sadd.s32 4294967294, %s3438_s27  }
  0x11   : > { %s3578_s29 = sadd.s32 1, %s3438_s27   ;;  %s487_s0 = sadd.s32 1, %s3434_s26 }
  0x12   : > { %4525 = sst [smem:[#allocation7_spill]] %s3578_s29  ;;  %s484_s4 = ssub.s32 %s3438_s27, %s3578_s29 }
  0x13   : > { %p497_p0 = scmp.ne.s32.totalorder %s3434_s26, %s3430_s25  ;;  %p485_p1 = scmp.eq.s32.totalorder %s484_s4, 0 }
  0x14   : > { %p498_p2 = scmp.eq.s32.totalorder %s3574_s3, 1  ;;  %p503_p3 = scmp.ne.s32.totalorder %s3430_s25, %s3426_s2 }
  0x15   : > { %p504_p4 = scmp.eq.s32.totalorder %s3062_s28, 1  ;;  %p3065_p7 = scmp.ge.s32.totalorder %s3438_s27, 1 }
  0x16   : > { %s3589_s30 = scalar_select %p485_p1, %s3434_s26, %s487_s0  }
  0x17   : > { %p3591_p5 = por %p498_p2, %p497_p0  ;;  %p3595_p6 = por %p504_p4, %p503_p3 }
  0x18   : > { %4526 = sst [smem:[#allocation8_spill]] %s3589_s30  ;;  %p590_p8 = scmp.lt.s32.totalorder %s3438_s27, 3 }
  0x19   : > { %s4528_s22 = scalar_select %p3595_p6, 1, 0 }
  0x1a   : > { %p591_p9 = pnand %p3065_p7, %p590_p8 }
  0x1b   : > { %4529 = sst [smem:[#allocation9_spill]] %s4528_s22  ;;  %p650_p10 = scmp.lt.s32.totalorder (!%p591_p9), %s3574_s3, 1 }
  0x1c   : > { %594 = sbr.rel (%p591_p9) target bundleno = 2351 (0x92f), region = 104  ;;  %s4530_s0 = sld [smem:[#allocation10_spill]] (!%p591_p9) }
  0x1d   : > { %s4531_s26 = sld [smem:[#allocation11_spill]] (!%p591_p9)  ;;  %s647_s30 = sand.u32 (!%p591_p9), 1, %s3430_s25  }
  0x1e   : > { %s4533_s22 = sld [smem:[#allocation12_spill]] (!%p591_p9) }
  0x1f   : > { %s4534_s28 = sld [smem:[#allocation13_spill]] (!%p591_p9) }
  0x20   : > { %s4535_s6 = sld [smem:[#allocation16_spill]] (!%p591_p9) }
  0x21   : > { %s651_s23 = scalar_select %p650_p10, %s3574_s3, 1  ;;  %vm673_vm0 = vcmask 392192   ;;  %v3440_v21 = vmov 0   ;;  %vm769_vm1 = vcmask 130048   ;;  %v1618_v37 = vld [vmem:[%s4490_s12 + $0x18] sm:$0xff]  ;;  %v1617_v39 = vld [vmem:[%s4490_s12 + $0x10] sm:$0xff] }
  0x22   : > { %3374 = vset.pattern.permute.xlu1 %v3440_v21  ;;  %3373 = vset.pattern.permute.xlu0 %v3440_v21  ;;  %s4536_s9 = sld [smem:[#allocation19_spill]]  ;;  %v1615_v40 = vld [vmem:[%s4490_s12] sm:$0xff]  ;;  %v2105_v42 = vld [vmem:[%s4494_s16 + $0x18] sm:$0xff]  ;;  %v2103_v43 = vld [vmem:[%s4494_s16 + $0x8] sm:$0xff]  ;;  %vm947_vm2 = vcmask 261120   ;;  %vm1042_vm3 = vcmask 64512  }
  0x23   : > { %s3329_s1 = smul.u32 48, %s651_s23  ;;  %s4532_s29 = smov %s4531_s26  ;;  %v661_v6 = vld [vmem:[%s4531_s26] sm:$0xff]  ;;  %3375 = vset.pattern.permute.xlu2 %v3440_v21  ;;  %v2700_v46 = vld [vmem:[%s4498_s20 + $0x8] sm:$0xff]  ;;  %v2701_v49 = vld [vmem:[%s4498_s20 + $0x10] sm:$0xff]  ;;  %vm1325_vm4 = vcmask 1043456   ;;  %vm1312_vm5 = vcmask 31744  }
  0x24   : > { %v662_v7 = vld [vmem:[%s4532_s29 + $0x8] sm:$0xff]  ;;  %v663_v8 = vld [vmem:[%s4532_s29 + $0x10] sm:$0xff]  ;;  %v664_v9 = vld [vmem:[%s4532_s29 + $0x18] sm:$0xff]  ;;  %s4537_s24 = sld [smem:[#allocation14_spill]]  ;;  %vm1633_vm6 = vcmask 1041408   ;;  %vm1620_vm7 = vcmask 15360  }
  0x25   : > { %s654_s4 = scalar_lea.vmem %s4530_s0, %s3329_s1  ;;  %v669_v10 = vld [vmem:[%s4532_s29 + $0x40] sm:$0xff]  ;;  %v768_v11 = vld [vmem:[%s4533_s22 + $0x8] sm:$0xff]  ;;  %v671_v15 = vld [vmem:[%s4532_s29 + $0x50] sm:$0xff]  ;;  %s4539_s7 = sld [smem:[#allocation17_spill]] }
  0x26   : > { %v660_v0 = vld [vmem:[%s654_s4 + $0x28] sm:$0xff]  ;;  %v659_v1 = vld [vmem:[%s654_s4 + $0x20] sm:$0xff]  ;;  %v658_v2 = vld [vmem:[%s654_s4 + $0x18] sm:$0xff]  ;;  %s4540_s8 = sld [smem:[#allocation18_spill]]  ;;  %s3328_s26 = smul.u32 48, %s647_s30 }
  0x27   : > { %720 = vmatpush.msra.mxu0 %v660_v0  ;;  %3322 = vmatpush.msra.mxu1 %v660_v0  ;;  %v657_v3 = vld [vmem:[%s654_s4 + $0x10] sm:$0xff]  ;;  %v656_v4 = vld [vmem:[%s654_s4 + $0x8] sm:$0xff]  ;;  %v655_v5 = vld [vmem:[%s654_s4] sm:$0xff]  ;;  %s4541_s10 = sld [smem:[#allocation20_spill]] }
  0x28   : > { %v665_v12 = vld [vmem:[%s4532_s29 + $0x20] sm:$0xff]  ;;  %v670_v13 = vld [vmem:[%s4532_s29 + $0x48] sm:$0xff]  ;;  %v667_v16 = vld [vmem:[%s4532_s29 + $0x30] sm:$0xff]  ;;  %s4430_s4 = scalar_lea.vmem [#allocation2], %s3328_s26 }
  0x29   : > { %721 = vmatpush.msra.mxu0 %v659_v1  ;;  %3323 = vmatpush.msra.mxu1 %v659_v1  ;;  %v666_v14 = vld [vmem:[%s4532_s29 + $0x28] sm:$0xff]  ;;  %v672_v17 = vld [vmem:[%s4532_s29 + $0x58] sm:$0xff]  ;;  %v767_v19 = vld [vmem:[%s4533_s22] sm:$0xff]  ;;  %s2997_s0 = sshll.u32 %s4430_s4, 4  ;;  %s2998_s0 = int_to_ptr.vmem [resolvable:$true] %s2997_s0 }
  0x2a   : > { %v668_v18 = vld [vmem:[%s4532_s29 + $0x38] sm:$0xff]  ;;  %v764_v20 = vld [vmem:[%s4534_s28 + $0x8] sm:$0xff]  ;;  %v763_v22 = vld [vmem:[%s4534_s28] sm:$0xff]  ;;  %s3330_s29 = smul.u32 48, %s3574_s3  ;;  %s2985_s3 = scalar_lea.sflag [#allocation3], %s647_s30 }
  0x2b   : > { %722 = vmatpush.msra.mxu0 %v658_v2  ;;  %3324 = vmatpush.msra.mxu1 %v658_v2  ;;  %v766_v23 = vld [vmem:[%s4534_s28 + $0x18] sm:$0xff]  ;;  %v765_v24 = vld [vmem:[%s4534_s28 + $0x10] sm:$0xff]  ;;  %v1038_v29 = vld [vmem:[%s4535_s6 + $0x8] sm:$0xff] }
  0x2c   : > { %818 = vperm.xlu1 %3374, %v764_v20   ;;  %828 = vperm.xlu0 %3373, %v766_v23   ;;  %v3084_v25 = vld [vmem:[%s4533_s22 + $0x18] sm:$0xff]  ;;  %v3083_v26 = vld [vmem:[%s4533_s22 + $0x10] sm:$0xff]  ;;  %v1037_v31 = vld [vmem:[%s4535_s6] sm:$0xff]  ;;  %s2996_s2 = scalar_lea.hbm %s4499_s21, %s3330_s29 }
  0x2d   : > { %723 = vmatpush.msra.mxu0 %v657_v3  ;;  %3325 = vmatpush.msra.mxu1 %v657_v3  ;;  %v1309_v32 = vld [vmem:[%s4536_s9 + $0x10] sm:$0xff]  ;;  %v3090_v34 = vld [vmem:[%s4533_s22 + $0x28] sm:$0xff]  ;;  %v3089_v36 = vld [vmem:[%s4533_s22 + $0x20] sm:$0xff]  ;;  %s4538_s22 = sld [smem:[#allocation15_spill]]  ;;  %s2999_s26 = sshll.u32 %s2996_s2, 4  ;;  %s3000_s26 = int_to_ptr.hbm [resolvable:$true] %s2999_s26 }
  0x2e   : > { %864 = vmatpush.msra.mxu3 %v3084_v25  ;;  %v1308_v35 = vld [vmem:[%s4536_s9 + $0x8] sm:$0xff]  ;;  %v2102_v45 = vld [vmem:[%s4494_s16] sm:$0xff]  ;;  %v937_v25 = vld [vmem:[%s4537_s24 + $0x10] sm:$0xff]  ;;  %s3396_s2 = scalar_lea.hbm %s4499_s21, 96 }
  0x2f   : > { %724 = vmatpush.msra.mxu0 %v656_v4  ;;  %3326 = vmatpush.msra.mxu1 %v656_v4  ;;  %v2703_v50 = vld [vmem:[%s4498_s20 + $0x20] sm:$0xff]  ;;  %v2704_v51 = vld [vmem:[%s4498_s20 + $0x28] sm:$0xff] }
  0x30   : > { %865 = vmatpush.msra.mxu3 %v3083_v26  ;;  %v935_v23 = vld [vmem:[%s4537_s24] sm:$0xff]  ;;  %v938_v26 = vld [vmem:[%s4537_s24 + $0x18] sm:$0xff] }
  0x31   : > { %725 = vmatpush.msra.mxu0 %v655_v5  ;;  %3327 = vmatpush.msra.mxu1 %v655_v5 }
  0x32   : > { %3067 = vmatmul.msk.f32.vlgmr.msra.gmra.mxu0 %vm673_vm0, %v661_v6  ;;  %3075 = vmatmul.msk.f32.vlgmr.msra.gmra.mxu1 %vm673_vm0, %v669_v10 }
  0x33   : > { %796 = vmatpush.msrb.mxu1 %v768_v11  ;;  %912 = vmatpush.msrb.mxu3 %v3090_v34  ;;  %v946_v34 = vld [vmem:[%s4537_s24 + $0x58] sm:$0xff] }
  0x34   : > { %813 = vperm.xlu1 %3374, %v763_v22   ;;  %823 = vperm.xlu0 %3373, %v765_v24   ;;  %v936_v24 = vld [vmem:[%s4537_s24 + $0x8] sm:$0xff] }
  0x35   : > { %797 = vmatpush.msrb.mxu1 %v767_v19  ;;  %913 = vmatpush.msrb.mxu3 %v3089_v36  ;;  %v3111_v36 = vld [vmem:[%s4538_s22 + $0x8] sm:$0xff] }
  0x3a   : > { %3068 = vmatmul.msk.f32.gmra.mxu0 %vm673_vm0, %v662_v7  ;;  %3076 = vmatmul.msk.f32.gmra.mxu1 %vm673_vm0, %v670_v13 }
  0x3c   : > { %1091 = vperm.xlu0 %3373, %v1038_v29   ;;  %1086 = vperm.xlu1 %3374, %v1037_v31   ;;  %v941_v29 = vld [vmem:[%s4537_s24 + $0x30] sm:$0xff]  ;;  %v943_v31 = vld [vmem:[%s4537_s24 + $0x40] sm:$0xff] }
  0x42   : > { %3069 = vmatmul.msk.f32.gmra.mxu0 %vm673_vm0, %v663_v8  ;;  %3077 = vmatmul.msk.f32.gmra.mxu1 %vm673_vm0, %v671_v15 }
  0x44   : > { %1370 = vperm.xlu0 %3373, %v1309_v32   ;;  %1365 = vperm.xlu1 %3374, %v1308_v35   ;;  %v944_v32 = vld [vmem:[%s4537_s24 + $0x48] sm:$0xff]  ;;  %v1041_v35 = vld [vmem:[%s4538_s22] sm:$0xff] }
  0x45   : > { %1070 = vmatpush.msra.mxu2 %v1041_v35  ;;  %v1207_v35 = vld [vmem:[%s4539_s7 + $0x8] sm:$0xff] }
  0x4a   : > { %3070 = vmatmul.msk.f32.gmra.mxu0 %vm673_vm0, %v664_v9  ;;  %3078 = vmatmul.msk.f32.gmra.mxu1 %vm673_vm0, %v672_v17 }
  0x4c   : > { %1683 = vperm.xlu0 %3373, %v1618_v37   ;;  %1678 = vperm.xlu1 %3374, %v1617_v39  }
  0x52   : > { %3071 = vmatmul.msk.f32.gmra.mxu0 %vm673_vm0, %v665_v12 }
  0x54   : > { %1668 = vperm.xlu0 %3373, %v1615_v40   ;;  %2168 = vperm.xlu1 %3374, %v2105_v42   ;;  %v1040_v40 = vld [vmem:[%s4535_s6 + $0x18] sm:$0xff]  ;;  %v3116_v42 = vld [vmem:[%s4538_s22 + $0x10] sm:$0xff] }
  0x55   : > { %1101 = vperm.xlu2 %3375, %v1040_v40   ;;  %1184 = vmatpush.msrb.mxu2 %v3116_v42  ;;  %v1212_v40 = vld [vmem:[%s4539_s7 + $0x30] sm:$0xff]  ;;  %v3144_v42 = vld [vmem:[%s4540_s8 + $0x8] sm:$0xf] }
  0x5a   : > { %3072 = vmatmul.msk.f32.gmra.mxu0 %vm673_vm0, %v666_v14 }
  0x5c   : > { %2158 = vperm.xlu0 %3373, %v2103_v43   ;;  %2153 = vperm.xlu1 %3374, %v2102_v45   ;;  %v1039_v43 = vld [vmem:[%s4535_s6 + $0x10] sm:$0xff]  ;;  %s3390_s6 = sshra.s32 %s3000_s26, 4  ;;  %s3391_s6 = int_to_ptr.hbm [resolvable:$true] %s3390_s6 }
  0x5d   : > { %1096 = vperm.xlu2 %3375, %v1039_v43   ;;  %v1214_v43 = vld [vmem:[%s4539_s7 + $0x40] sm:$0xff]  ;;  %s3392_s29 = scalar_lea.hbm %s3391_s6, 48  ;;  %p3397_p0 = scmp.lt.s32.totalorder %s3391_s6, %s4499_s21 }
  0x5e   : > { %p3393_p11 = scmp.ne.s32.totalorder %s3391_s6, %s3392_s29  ;;  %p3398_p1 = scmp.lt.s32.totalorder %s3396_s2, %s3392_s29 }
  0x60   : > { %p3394_p12 = pnand %p3393_p11, %p3591_p5  ;;  %p3399_p2 = por %p3398_p1, %p3397_p0 }
  0x62   : > { %3073 = vmatmul.msk.f32.gmra.mxu0 %vm673_vm0, %v667_v16  ;;  %p3395_p13 = pneg %p3394_p12 }
  0x64   : > { %2766 = vperm.xlu0 %3373, %v2700_v46   ;;  %2771 = vperm.xlu1 %3374, %v2701_v49   ;;  %v1310_v46 = vld [vmem:[%s4536_s9 + $0x18] sm:$0xff]  ;;  %p3400_p3 = pnand %p3399_p2, %p3395_p13 }
  0x65   : > { %1375 = vperm.xlu2 %3375, %v1310_v46   ;;  %v1217_v46 = vld [vmem:[%s4539_s7 + $0x58] sm:$0xff] }
  0x6a   : > { %3074 = vmatmul.msk.f32.gmra.mxu0 %vm673_vm0, %v668_v18 }
  0x6c   : > { %2781 = vperm.xlu0 %3373, %v2703_v50   ;;  %2786 = vperm.xlu1 %3374, %v2704_v51   ;;  %v1616_v50 = vld [vmem:[%s4490_s12 + $0x8] sm:$0xff]  ;;  %v2104_v51 = vld [vmem:[%s4494_s16 + $0x10] sm:$0xff] }
  0x9e   : > { %v829_v62 = vpop.permute.xlu0 %828  ;;  %v819_v1 = vpop.permute.xlu1 %818 }
  0xa6   : > { %v824_v3 = vpop.permute.xlu0 %823  ;;  %v814_v7 = vpop.permute.xlu1 %813 }
  0xaf   : > { %v727_v27 = vpop.f32.mrf.mxu0  ;;  %v751_v48 = vpop.f32.mrf.mxu1 }
  0xb0   : > { %3079 = vmatmul.msk.f32.vlgmr.msrb.gmra.mxu1 %vm769_vm1, %v727_v27  ;;  %v939_v27 = vld [vmem:[%s4537_s24 + $0x20] sm:$0xff] }
  0xb7   : > { %v730_v28 = vpop.f32.mrf.mxu0  ;;  %v754_v52 = vpop.f32.mrf.mxu1 }
  0xb8   : > { %3080 = vmatmul.msk.f32.gmra.mxu1 %vm769_vm1, %v730_v28  ;;  %v940_v28 = vld [vmem:[%s4537_s24 + $0x28] sm:$0xff] }
  0xbf   : > { %v733_v30 = vpop.f32.mrf.mxu0  ;;  %v757_v53 = vpop.f32.mrf.mxu1 }
  0xc0   : > { %3081 = vmatmul.msk.f32.gmra.mxu1 %vm769_vm1, %v733_v30  ;;  %v942_v30 = vld [vmem:[%s4537_s24 + $0x38] sm:$0xff] }
  0xc7   : > { %v736_v33 = vpop.f32.mrf.mxu0  ;;  %v760_v54 = vpop.f32.mrf.mxu1 }
  0xc8   : > { %3082 = vmatmul.msk.f32.gmra.mxu1 %vm769_vm1, %v736_v33  ;;  %v945_v33 = vld [vmem:[%s4537_s24 + $0x50] sm:$0xff] }
  0xcf   : > { %v739_v38 = vpop.f32.mrf.mxu0 }
  0xd0   : > { %3085 = vmatmul.msk.f32.vlgmr.msra.gmra.mxu3 %vm769_vm1, %v739_v38 }
  0xd1   : > { %1137 = vmatpush.msra.mxu3 %v3111_v36  ;;  %v1208_v36 = vld [vmem:[%s4539_s7 + $0x10] sm:$0xff] }
  0xd7   : > { %v742_v41 = vpop.f32.mrf.mxu0 }
  0xd8   : > { %3086 = vmatmul.msk.f32.gmra.mxu3 %vm769_vm1, %v742_v41 }
  0xdf   : > { %v745_v44 = vpop.f32.mrf.mxu0 }
  0xe0   : > { %3087 = vmatmul.msk.f32.gmra.mxu3 %vm769_vm1, %v745_v44 }
  0xe7   : > { %v748_v47 = vpop.f32.mrf.mxu0 }
  0xe8   : > { %3088 = vmatmul.msk.f32.gmra.mxu3 %vm769_vm1, %v748_v47 }
  0xf0   : > { %3091 = vmatmul.msk.f32.vlgmr.msrb.gmra.mxu3 %vm769_vm1, %v751_v48  ;;  %v1307_v48 = vld [vmem:[%s4536_s9] sm:$0xff] }
  0xf1   : > { %1360 = vperm.xlu2 %3375, %v1307_v48   ;;  %v3138_v48 = vld [vmem:[%s4540_s8 + $0x4] sm:$0xf] }
  0xf2   : > { %3139 = vmatpush.msk.msrb.mxu0 %vm1325_vm4, %v3138_v48  ;;  %v1501_v48 = vld [vmem:[%s4541_s10 + $0x78] sm:$0xff] }
  0xf8   : > { %3092 = vmatmul.msk.f32.gmra.mxu3 %vm769_vm1, %v754_v52 }
  0xf9   : > { %1673 = vperm.xlu2 %3375, %v1616_v50  }
 0x100   : > { %3093 = vmatmul.msk.f32.gmra.mxu3 %vm769_vm1, %v757_v53  ;;  %v2699_v53 = vld [vmem:[%s4498_s20] sm:$0xff] }
 0x101   : > { %2163 = vperm.xlu2 %3375, %v2104_v51  }
 0x108   : > { %3094 = vmatmul.msk.f32.gmra.mxu3 %vm769_vm1, %v760_v54 }
 0x109   : > { %2761 = vperm.xlu2 %3375, %v2699_v53   ;;  %v3171_v53 = vld [vmem:[%s4489_s11 + $0x2] sm:$0x3] }
 0x12d   : > { %v799_v58 = vpop.f32.mrf.mxu1 }
 0x12e   : > { %v831_v12 = vadd.f32 %v814_v7, %v799_v58 }
 0x135   : > { %v802_v60 = vpop.f32.mrf.mxu1 }
 0x136   : > { %v832_v8 = vadd.f32 %v819_v1, %v802_v60  ;;  %v1102_v1 = vpop.permute.xlu2 %1101 }
 0x13d   : > { %v805_v63 = vpop.f32.mrf.mxu1 }
 0x13e   : > { %v833_v5 = vadd.f32 %v824_v3, %v805_v63 }
 0x145   : > { %v808_v4 = vpop.f32.mrf.mxu1 }
 0x146   : > { %v834_v6 = vadd.f32 %v829_v62, %v808_v4 }
 0x153   : > { %v867_v55 = vpop.f32.mrf.mxu3 }
 0x154   : > { %v879_v16 = vadd.f32 %v867_v55, %v831_v12  ;;  %v2702_v55 = vld [vmem:[%s4498_s20 + $0x18] sm:$0xff] }
 0x155   : > { %2776 = vperm.xlu2 %3375, %v2702_v55  }
 0x15b   : > { %v870_v56 = vpop.f32.mrf.mxu3 }
 0x15c   : > { %v880_v13 = vadd.f32 %v870_v56, %v832_v8 }
 0x163   : > { %v873_v57 = vpop.f32.mrf.mxu3 }
 0x164   : > { %v881_v9 = vadd.f32 %v873_v57, %v833_v5  ;;  %v1097_v5 = vpop.permute.xlu2 %1096 }
 0x16b   : > { %v876_v59 = vpop.f32.mrf.mxu3 }
 0x16c   : > { %v882_v10 = vadd.f32 %v876_v59, %v834_v6 }
 0x173   : > { %v915_v61 = vpop.f32.mrf.mxu3 }
 0x174   : > { %v3745_v19 = vadd.f32 %v915_v61, %v879_v16 }
 0x176   : > { %v931_v22 = vmax.f32 %v3745_v19, 0.0  ;;  %v1492_v19 = vld [vmem:[%s4541_s10 + $0x30] sm:$0xff] }
 0x17b   : > { %v918_v0 = vpop.f32.mrf.mxu3 }
 0x17c   : > { %v3742_v17 = vadd.f32 %v918_v0, %v880_v13  ;;  %v1087_v13 = vpop.permute.xlu1 %1086 }
 0x17e   : > { %v932_v21 = vmax.f32 %v3742_v17, 0.0  ;;  %v1490_v17 = vld [vmem:[%s4541_s10 + $0x20] sm:$0xff] }
 0x183   : > { %v921_v2 = vpop.f32.mrf.mxu3 }
 0x184   : > { %v3738_v14 = vadd.f32 %v921_v2, %v881_v9  ;;  %v1092_v9 = vpop.permute.xlu0 %1091 }
 0x186   : > { %v933_v20 = vmax.f32 %v3738_v14, 0.0  ;;  %v1489_v14 = vld [vmem:[%s4541_s10 + $0x18] sm:$0xff] }
 0x18b   : > { %v924_v11 = vpop.f32.mrf.mxu3 }
 0x18c   : > { %v3740_v15 = vadd.f32 %v924_v11, %v882_v10 }
 0x18e   : > { %v934_v18 = vmax.f32 %v3740_v15, 0.0  ;;  %v1488_v15 = vld [vmem:[%s4541_s10 + $0x10] sm:$0xff] }
 0x190   : > { %996 = vmatpush.msra.mxu1 %v934_v18 }
 0x192   : > { %997 = vmatpush.msra.mxu1 %v933_v20 }
 0x194   : > { %998 = vmatpush.msra.mxu1 %v932_v21 }
 0x196   : > { %999 = vmatpush.msra.mxu1 %v931_v22 }
 0x197   : > { %3095 = vmatmul.msk.f32.vlgmr.msra.gmra.mxu1 %vm947_vm2, %v935_v23 }
 0x198   : > { %3145 = vmatpush.msk.msrb.mxu1 %vm1325_vm4, %v3144_v42  ;;  %v1497_v42 = vld [vmem:[%s4541_s10 + $0x58] sm:$0xff] }
 0x19a   : > { %3172 = vmatpush.msk.msra.mxu1 %vm1633_vm6, %v3171_v53 }
 0x19f   : > { %3096 = vmatmul.msk.f32.gmra.mxu1 %vm947_vm2, %v936_v24 }
 0x1a7   : > { %3097 = vmatmul.msk.f32.gmra.mxu1 %vm947_vm2, %v937_v25 }
 0x1af   : > { %3098 = vmatmul.msk.f32.gmra.mxu1 %vm947_vm2, %v938_v26 }
 0x1b7   : > { %3099 = vmatmul.msk.f32.gmra.mxu1 %vm947_vm2, %v939_v27 }
 0x1bf   : > { %3100 = vmatmul.msk.f32.gmra.mxu1 %vm947_vm2, %v940_v28 }
 0x1c7   : > { %3101 = vmatmul.msk.f32.gmra.mxu1 %vm947_vm2, %v941_v29 }
 0x1cf   : > { %3102 = vmatmul.msk.f32.gmra.mxu1 %vm947_vm2, %v942_v30 }
 0x1d7   : > { %3103 = vmatmul.msk.f32.gmra.mxu1 %vm947_vm2, %v943_v31 }
 0x1df   : > { %3104 = vmatmul.msk.f32.gmra.mxu1 %vm947_vm2, %v944_v32 }
 0x1e7   : > { %3105 = vmatmul.msk.f32.gmra.mxu1 %vm947_vm2, %v945_v33 }
 0x1ef   : > { %3106 = vmatmul.msk.f32.gmra.mxu1 %vm947_vm2, %v946_v34  ;;  %v1206_v34 = vld [vmem:[%s4539_s7] sm:$0xff] }
 0x214   : > { %v1001_v37 = vpop.f32.mrf.mxu1 }
 0x215   : > { %3107 = vmatmul.msk.f32.vlgmr.msra.gmra.mxu2 %vm1042_vm3, %v1001_v37  ;;  %v1209_v37 = vld [vmem:[%s4539_s7 + $0x18] sm:$0xff] }
 0x21c   : > { %v1004_v38 = vpop.f32.mrf.mxu1 }
 0x21d   : > { %3108 = vmatmul.msk.f32.gmra.mxu2 %vm1042_vm3, %v1004_v38  ;;  %v1210_v38 = vld [vmem:[%s4539_s7 + $0x20] sm:$0xff] }
 0x224   : > { %v1007_v39 = vpop.f32.mrf.mxu1 }
 0x225   : > { %3109 = vmatmul.msk.f32.gmra.mxu2 %vm1042_vm3, %v1007_v39  ;;  %v1211_v39 = vld [vmem:[%s4539_s7 + $0x28] sm:$0xff] }
 0x22c   : > { %v1010_v41 = vpop.f32.mrf.mxu1 }
 0x22d   : > { %3110 = vmatmul.msk.f32.gmra.mxu2 %vm1042_vm3, %v1010_v41  ;;  %v1213_v41 = vld [vmem:[%s4539_s7 + $0x38] sm:$0xff] }
 0x234   : > { %v1013_v44 = vpop.f32.mrf.mxu1 }
 0x235   : > { %3112 = vmatmul.msk.f32.vlgmr.msra.gmra.mxu3 %vm1042_vm3, %v1013_v44  ;;  %v1215_v44 = vld [vmem:[%s4539_s7 + $0x48] sm:$0xff] }
 0x23c   : > { %v1016_v45 = vpop.f32.mrf.mxu1 }
 0x23d   : > { %3113 = vmatmul.msk.f32.gmra.mxu3 %vm1042_vm3, %v1016_v45  ;;  %v1216_v45 = vld [vmem:[%s4539_s7 + $0x50] sm:$0xff] }
 0x244   : > { %v1019_v47 = vpop.f32.mrf.mxu1 }
 0x245   : > { %3114 = vmatmul.msk.f32.gmra.mxu3 %vm1042_vm3, %v1019_v47  ;;  %v1311_v47 = vld [vmem:[%s4540_s8] sm:$0xf] }
 0x246   : > { %3133 = vmatpush.msk.msra.mxu2 %vm1325_vm4, %v1311_v47  ;;  %v3177_v47 = vld [vmem:[%s4489_s11 + $0x4] sm:$0x3] }
 0x24c   : > { %v1022_v49 = vpop.f32.mrf.mxu1 }
 0x24d   : > { %3115 = vmatmul.msk.f32.gmra.mxu3 %vm1042_vm3, %v1022_v49 }
 0x254   : > { %v1025_v52 = vpop.f32.mrf.mxu1 }
 0x255   : > { %3117 = vmatmul.msk.f32.vlgmr.msrb.gmra.mxu2 %vm1042_vm3, %v1025_v52 }
 0x25c   : > { %v1028_v54 = vpop.f32.mrf.mxu1 }
 0x25d   : > { %3118 = vmatmul.msk.f32.gmra.mxu2 %vm1042_vm3, %v1028_v54 }
 0x264   : > { %v1031_v56 = vpop.f32.mrf.mxu1 }
 0x265   : > { %3119 = vmatmul.msk.f32.gmra.mxu2 %vm1042_vm3, %v1031_v56 }
 0x26c   : > { %v1034_v57 = vpop.f32.mrf.mxu1 }
 0x26d   : > { %3120 = vmatmul.msk.f32.gmra.mxu2 %vm1042_vm3, %v1034_v57 }
 0x298   : > { %v1072_v58 = vpop.f32.mrf.mxu2 }
 0x299   : > { %v1104_v23 = vadd.f32 %v1087_v13, %v1072_v58  ;;  %v1366_v13 = vpop.permute.xlu1 %1365 }
 0x2a0   : > { %v1075_v59 = vpop.f32.mrf.mxu2 }
 0x2a1   : > { %v1105_v10 = vadd.f32 %v1092_v9, %v1075_v59  ;;  %v1371_v9 = vpop.permute.xlu0 %1370 }
 0x2a8   : > { %v1078_v60 = vpop.f32.mrf.mxu2 }
 0x2a9   : > { %v1106_v7 = vadd.f32 %v1097_v5, %v1078_v60 }
 0x2b0   : > { %v1081_v62 = vpop.f32.mrf.mxu2 }
 0x2b1   : > { %v1107_v8 = vadd.f32 %v1102_v1, %v1081_v62 }
 0x2b8   : > { %v1139_v61 = vpop.f32.mrf.mxu3 }
 0x2b9   : > { %v1151_v27 = vadd.f32 %v1139_v61, %v1104_v23 }
 0x2c0   : > { %v1142_v63 = vpop.f32.mrf.mxu3 }
 0x2c1   : > { %v1152_v24 = vadd.f32 %v1142_v63, %v1105_v10 }
 0x2c8   : > { %v1145_v3 = vpop.f32.mrf.mxu3 }
 0x2c9   : > { %v1153_v11 = vadd.f32 %v1145_v3, %v1106_v7 }
 0x2d0   : > { %v1148_v6 = vpop.f32.mrf.mxu3 }
 0x2d1   : > { %v1154_v12 = vadd.f32 %v1148_v6, %v1107_v8  ;;  %v1376_v6 = vpop.permute.xlu2 %1375 }
 0x2d8   : > { %v1186_v0 = vpop.f32.mrf.mxu2 }
 0x2d9   : > { %v3858_v30 = vadd.f32 %v1186_v0, %v1151_v27 }
 0x2db   : > { %v1202_v33 = vmax.f32 %v3858_v30, 0.0 }
 0x2e0   : > { %v1189_v2 = vpop.f32.mrf.mxu2 }
 0x2e1   : > { %v3855_v28 = vadd.f32 %v1189_v2, %v1152_v24 }
 0x2e3   : > { %v1203_v32 = vmax.f32 %v3855_v28, 0.0 }
 0x2e8   : > { %v1192_v4 = vpop.f32.mrf.mxu2 }
 0x2e9   : > { %v3851_v25 = vadd.f32 %v1192_v4, %v1153_v11 }
 0x2eb   : > { %v1204_v31 = vmax.f32 %v3851_v25, 0.0  ;;  %v1361_v25 = vpop.permute.xlu2 %1360 }
 0x2f0   : > { %v1195_v16 = vpop.f32.mrf.mxu2 }
 0x2f1   : > { %v3853_v26 = vadd.f32 %v1195_v16, %v1154_v12 }
 0x2f3   : > { %v1205_v29 = vmax.f32 %v3853_v26, 0.0 }
 0x2f5   : > { %1266 = vmatpush.msrb.mxu3 %v1205_v29 }
 0x2f7   : > { %1267 = vmatpush.msrb.mxu3 %v1204_v31 }
 0x2f9   : > { %1268 = vmatpush.msrb.mxu3 %v1203_v32 }
 0x2fb   : > { %1269 = vmatpush.msrb.mxu3 %v1202_v33 }
 0x2fc   : > { %3121 = vmatmul.msk.f32.vlgmr.msrb.gmra.mxu3 %vm947_vm2, %v1206_v34 }
 0x2fd   : > { %3178 = vmatpush.msk.msra.mxu3 %vm1633_vm6, %v3177_v47  ;;  %v1864_v47 = vld [vmem:[%s4492_s14 + $0x20] sm:$0xff] }
 0x304   : > { %3122 = vmatmul.msk.f32.gmra.mxu3 %vm947_vm2, %v1207_v35 }
 0x30c   : > { %3123 = vmatmul.msk.f32.gmra.mxu3 %vm947_vm2, %v1208_v36 }
 0x314   : > { %3124 = vmatmul.msk.f32.gmra.mxu3 %vm947_vm2, %v1209_v37 }
 0x31c   : > { %3125 = vmatmul.msk.f32.gmra.mxu3 %vm947_vm2, %v1210_v38  ;;  %v1486_v38 = vld [vmem:[%s4541_s10] sm:$0xff] }
 0x324   : > { %3126 = vmatmul.msk.f32.gmra.mxu3 %vm947_vm2, %v1211_v39  ;;  %v3232_v39 = vld [vmem:[%s4493_s15 + $0x8] sm:$0xf] }
 0x32c   : > { %3127 = vmatmul.msk.f32.gmra.mxu3 %vm947_vm2, %v1212_v40  ;;  %v1487_v40 = vld [vmem:[%s4541_s10 + $0x8] sm:$0xff] }
 0x334   : > { %3128 = vmatmul.msk.f32.gmra.mxu3 %vm947_vm2, %v1213_v41  ;;  %v1496_v41 = vld [vmem:[%s4541_s10 + $0x50] sm:$0xff] }
 0x33c   : > { %3129 = vmatmul.msk.f32.gmra.mxu3 %vm947_vm2, %v1214_v43  ;;  %v1498_v43 = vld [vmem:[%s4541_s10 + $0x60] sm:$0xff] }
 0x344   : > { %3130 = vmatmul.msk.f32.gmra.mxu3 %vm947_vm2, %v1215_v44  ;;  %v1619_v44 = vld [vmem:[%s4489_s11] sm:$0x3] }
 0x345   : > { %3166 = vmatpush.msk.msra.mxu0 %vm1633_vm6, %v1619_v44 }
 0x34c   : > { %3131 = vmatmul.msk.f32.gmra.mxu3 %vm947_vm2, %v1216_v45  ;;  %v1499_v45 = vld [vmem:[%s4541_s10 + $0x68] sm:$0xff] }
 0x354   : > { %3132 = vmatmul.msk.f32.gmra.mxu3 %vm947_vm2, %v1217_v46  ;;  %v1500_v46 = vld [vmem:[%s4541_s10 + $0x70] sm:$0xff] }
 0x37f   : > { %v1271_v49 = vpop.f32.mrf.mxu3 }
 0x380   : > { %3134 = vmatmul.msk.f32.vlgmr.msra.gmra.mxu2 %vm1312_vm5, %v1271_v49 }
 0x387   : > { %v1274_v50 = vpop.f32.mrf.mxu3 }
 0x388   : > { %3135 = vmatmul.msk.f32.gmra.mxu2 %vm1312_vm5, %v1274_v50 }
 0x38f   : > { %v1277_v51 = vpop.f32.mrf.mxu3 }
 0x390   : > { %3136 = vmatmul.msk.f32.gmra.mxu2 %vm1312_vm5, %v1277_v51 }
 0x397   : > { %v1280_v52 = vpop.f32.mrf.mxu3 }
 0x398   : > { %3137 = vmatmul.msk.f32.gmra.mxu2 %vm1312_vm5, %v1280_v52 }
 0x39f   : > { %v1283_v54 = vpop.f32.mrf.mxu3 }
 0x3a0   : > { %3140 = vmatmul.msk.f32.vlgmr.msrb.gmra.mxu0 %vm1312_vm5, %v1283_v54 }
 0x3a7   : > { %v1286_v55 = vpop.f32.mrf.mxu3 }
 0x3a8   : > { %3141 = vmatmul.msk.f32.gmra.mxu0 %vm1312_vm5, %v1286_v55 }
 0x3af   : > { %v1289_v56 = vpop.f32.mrf.mxu3 }
 0x3b0   : > { %3142 = vmatmul.msk.f32.gmra.mxu0 %vm1312_vm5, %v1289_v56 }
 0x3b7   : > { %v1292_v57 = vpop.f32.mrf.mxu3 }
 0x3b8   : > { %3143 = vmatmul.msk.f32.gmra.mxu0 %vm1312_vm5, %v1292_v57  ;;  %v3183_v57 = vld [vmem:[%s4489_s11 + $0x6] sm:$0x3] }
 0x3b9   : > { %3184 = vmatpush.msk.msrb.mxu0 %vm1633_vm6, %v3183_v57  ;;  %v1869_v57 = vld [vmem:[%s4492_s14 + $0x48] sm:$0xff] }
 0x3bf   : > { %v1295_v58 = vpop.f32.mrf.mxu3 }
 0x3c0   : > { %3146 = vmatmul.msk.f32.vlgmr.msrb.gmra.mxu1 %vm1312_vm5, %v1295_v58 }
 0x3c1   : > { %1936 = vmatpush.msrb.mxu1 %v1205_v29 }
 0x3c3   : > { %1937 = vmatpush.msrb.mxu1 %v1204_v31 }
 0x3c5   : > { %1938 = vmatpush.msrb.mxu1 %v1203_v32 }
 0x3c7   : > { %1939 = vmatpush.msrb.mxu1 %v1202_v33  ;;  %v1298_v59 = vpop.f32.mrf.mxu3 }
 0x3c8   : > { %3147 = vmatmul.msk.f32.gmra.mxu1 %vm1312_vm5, %v1298_v59 }
 0x3cf   : > { %v1301_v60 = vpop.f32.mrf.mxu3 }
 0x3d0   : > { %3148 = vmatmul.msk.f32.gmra.mxu1 %vm1312_vm5, %v1301_v60 }
 0x3d7   : > { %v1304_v61 = vpop.f32.mrf.mxu3 }
 0x3d8   : > { %3149 = vmatmul.msk.f32.gmra.mxu1 %vm1312_vm5, %v1304_v61 }
 0x403   : > { %v1346_v62 = vpop.f32.mrf.mxu2 }
 0x404   : > { %v1378_v27 = vadd.f32 %v1361_v25, %v1346_v62 }
 0x40b   : > { %v1349_v0 = vpop.f32.mrf.mxu2 }
 0x40c   : > { %v1379_v16 = vadd.f32 %v1366_v13, %v1349_v0 }
 0x413   : > { %v1352_v3 = vpop.f32.mrf.mxu2 }
 0x414   : > { %v1380_v11 = vadd.f32 %v1371_v9, %v1352_v3 }
 0x41b   : > { %v1355_v8 = vpop.f32.mrf.mxu2 }
 0x41c   : > { %v1381_v12 = vadd.f32 %v1376_v6, %v1355_v8 }
 0x41d   : > { %v1416_v63 = vpop.f32.mrf.mxu0 }
 0x41e   : > { %v1428_v31 = vadd.f32 %v1416_v63, %v1378_v27 }
 0x425   : > { %v1419_v1 = vpop.f32.mrf.mxu0 }
 0x426   : > { %v1429_v28 = vadd.f32 %v1419_v1, %v1379_v16 }
 0x42d   : > { %v1422_v5 = vpop.f32.mrf.mxu0 }
 0x42e   : > { %v1430_v23 = vadd.f32 %v1422_v5, %v1380_v11  ;;  %v1860_v11 = vld [vmem:[%s4492_s14] sm:$0xff] }
 0x435   : > { %v1425_v10 = vpop.f32.mrf.mxu0 }
 0x436   : > { %v1431_v24 = vadd.f32 %v1425_v10, %v1381_v12 }
 0x43d   : > { %v1466_v2 = vpop.f32.mrf.mxu1 }
 0x43e   : > { %v1478_v34 = vadd.f32 %v1466_v2, %v1428_v31 }
 0x440   : > { %v1482_v37 = vmax.f32 %v1478_v34, 0.0 }
 0x445   : > { %v1469_v4 = vpop.f32.mrf.mxu1 }
 0x446   : > { %v1479_v32 = vadd.f32 %v1469_v4, %v1429_v28 }
 0x448   : > { %v1483_v36 = vmax.f32 %v1479_v32, 0.0  ;;  %v1862_v32 = vld [vmem:[%s4492_s14 + $0x10] sm:$0xff] }
 0x44d   : > { %v1472_v7 = vpop.f32.mrf.mxu1 }
 0x44e   : > { %v1480_v29 = vadd.f32 %v1472_v7, %v1430_v23  ;;  %v1684_v23 = vpop.permute.xlu0 %1683 }
 0x450   : > { %v1484_v35 = vmax.f32 %v1480_v29, 0.0 }
 0x455   : > { %v1475_v26 = vpop.f32.mrf.mxu1 }
 0x456   : > { %v1481_v30 = vadd.f32 %v1475_v26, %v1431_v24  ;;  %v1861_v24 = vld [vmem:[%s4492_s14 + $0x8] sm:$0xff]  ;;  %v1679_v26 = vpop.permute.xlu1 %1678 }
 0x458   : > { %v1485_v33 = vmax.f32 %v1481_v30, 0.0  ;;  %v1674_v30 = vpop.permute.xlu2 %1673 }
 0x45a   : > { %1562 = vmatpush.msrb.mxu2 %v1485_v33 }
 0x45c   : > { %1563 = vmatpush.msrb.mxu2 %v1484_v35 }
 0x45e   : > { %1564 = vmatpush.msrb.mxu2 %v1483_v36  ;;  %v1669_v36 = vpop.permute.xlu0 %1668 }
 0x460   : > { %1565 = vmatpush.msrb.mxu2 %v1482_v37 }
 0x461   : > { %3150 = vmatmul.msk.f32.vlgmr.msrb.gmra.mxu2 %vm947_vm2, %v1486_v38 }
 0x462   : > { %3233 = vmatpush.msk.msra.mxu2 %vm1325_vm4, %v3232_v39 }
 0x464   : > { %2461 = vmatpush.msrb.mxu2 %v934_v18  ;;  %v1491_v18 = vld [vmem:[%s4541_s10 + $0x28] sm:$0xff] }
 0x466   : > { %2462 = vmatpush.msrb.mxu2 %v933_v20  ;;  %v1493_v20 = vld [vmem:[%s4541_s10 + $0x38] sm:$0xff] }
 0x468   : > { %2463 = vmatpush.msrb.mxu2 %v932_v21  ;;  %v1494_v21 = vld [vmem:[%s4541_s10 + $0x40] sm:$0xff] }
 0x469   : > { %3151 = vmatmul.msk.f32.gmra.mxu2 %vm947_vm2, %v1487_v40 }
 0x46a   : > { %2464 = vmatpush.msrb.mxu2 %v931_v22  ;;  %v1495_v22 = vld [vmem:[%s4541_s10 + $0x48] sm:$0xff] }
 0x471   : > { %3152 = vmatmul.msk.f32.gmra.mxu2 %vm947_vm2, %v1488_v15 }
 0x479   : > { %3153 = vmatmul.msk.f32.gmra.mxu2 %vm947_vm2, %v1489_v14 }
 0x481   : > { %3154 = vmatmul.msk.f32.gmra.mxu2 %vm947_vm2, %v1490_v17 }
 0x489   : > { %3155 = vmatmul.msk.f32.gmra.mxu2 %vm947_vm2, %v1491_v18 }
 0x491   : > { %3156 = vmatmul.msk.f32.gmra.mxu2 %vm947_vm2, %v1492_v19 }
 0x499   : > { %3157 = vmatmul.msk.f32.gmra.mxu2 %vm947_vm2, %v1493_v20 }
 0x4a1   : > { %3158 = vmatmul.msk.f32.gmra.mxu2 %vm947_vm2, %v1494_v21 }
 0x4a9   : > { %3159 = vmatmul.msk.f32.gmra.mxu2 %vm947_vm2, %v1495_v22 }
 0x4b1   : > { %3160 = vmatmul.msk.f32.gmra.mxu2 %vm947_vm2, %v1496_v41  ;;  %v1863_v41 = vld [vmem:[%s4492_s14 + $0x18] sm:$0xff] }
 0x4b9   : > { %3161 = vmatmul.msk.f32.gmra.mxu2 %vm947_vm2, %v1497_v42 }
 0x4c1   : > { %3162 = vmatmul.msk.f32.gmra.mxu2 %vm947_vm2, %v1498_v43 }
 0x4c9   : > { %3163 = vmatmul.msk.f32.gmra.mxu2 %vm947_vm2, %v1499_v45 }
 0x4d1   : > { %3164 = vmatmul.msk.f32.gmra.mxu2 %vm947_vm2, %v1500_v46  ;;  %v1844_v46 = vld [vmem:[%s4491_s13] sm:$0xff] }
 0x4d9   : > { %3165 = vmatmul.msk.f32.gmra.mxu2 %vm947_vm2, %v1501_v48  ;;  %v1845_v48 = vld [vmem:[%s4491_s13 + $0x8] sm:$0xff] }
 0x4e4   : > { %v1567_v49 = vpop.f32.mrf.mxu2 }
 0x4e5   : > { %3167 = vmatmul.msk.f32.vlgmr.msra.gmra.mxu0 %vm1620_vm7, %v1567_v49  ;;  %v1865_v49 = vld [vmem:[%s4492_s14 + $0x28] sm:$0xff] }
 0x4ec   : > { %v1570_v50 = vpop.f32.mrf.mxu2 }
 0x4ed   : > { %3168 = vmatmul.msk.f32.gmra.mxu0 %vm1620_vm7, %v1570_v50  ;;  %v1846_v50 = vld [vmem:[%s4491_s13 + $0x10] sm:$0xff] }
 0x4f4   : > { %v1573_v51 = vpop.f32.mrf.mxu2 }
 0x4f5   : > { %3169 = vmatmul.msk.f32.gmra.mxu0 %vm1620_vm7, %v1573_v51  ;;  %v1866_v51 = vld [vmem:[%s4492_s14 + $0x30] sm:$0xff] }
 0x4fc   : > { %v1576_v52 = vpop.f32.mrf.mxu2 }
 0x4fd   : > { %3170 = vmatmul.msk.f32.gmra.mxu0 %vm1620_vm7, %v1576_v52  ;;  %v1847_v52 = vld [vmem:[%s4491_s13 + $0x18] sm:$0xff] }
 0x504   : > { %v1579_v53 = vpop.f32.mrf.mxu2 }
 0x505   : > { %3173 = vmatmul.msk.f32.vlgmr.msra.gmra.mxu1 %vm1620_vm7, %v1579_v53  ;;  %v1867_v53 = vld [vmem:[%s4492_s14 + $0x38] sm:$0xff] }
 0x50c   : > { %v1582_v54 = vpop.f32.mrf.mxu2 }
 0x50d   : > { %3174 = vmatmul.msk.f32.gmra.mxu1 %vm1620_vm7, %v1582_v54  ;;  %v1848_v54 = vld [vmem:[%s4491_s13 + $0x20] sm:$0xff] }
 0x514   : > { %v1585_v55 = vpop.f32.mrf.mxu2 }
 0x515   : > { %3175 = vmatmul.msk.f32.gmra.mxu1 %vm1620_vm7, %v1585_v55  ;;  %v1868_v55 = vld [vmem:[%s4492_s14 + $0x40] sm:$0xff] }
 0x51c   : > { %v1588_v56 = vpop.f32.mrf.mxu2 }
 0x51d   : > { %3176 = vmatmul.msk.f32.gmra.mxu1 %vm1620_vm7, %v1588_v56  ;;  %v1849_v56 = vld [vmem:[%s4491_s13 + $0x28] sm:$0xff] }
 0x524   : > { %v1591_v58 = vpop.f32.mrf.mxu2 }
 0x525   : > { %3179 = vmatmul.msk.f32.vlgmr.msra.gmra.mxu3 %vm1620_vm7, %v1591_v58  ;;  %3189 = vmatmul.msk.f32.vlgmr.msrb.gmra.mxu1 %vm947_vm2, %v1860_v11  ;;  %v1850_v58 = vld [vmem:[%s4491_s13 + $0x30] sm:$0xff] }
 0x52c   : > { %v1594_v59 = vpop.f32.mrf.mxu2 }
 0x52d   : > { %3180 = vmatmul.msk.f32.gmra.mxu3 %vm1620_vm7, %v1594_v59  ;;  %3190 = vmatmul.msk.f32.gmra.mxu1 %vm947_vm2, %v1861_v24  ;;  %v1870_v59 = vld [vmem:[%s4492_s14 + $0x50] sm:$0xff] }
 0x534   : > { %v1597_v60 = vpop.f32.mrf.mxu2 }
 0x535   : > { %3181 = vmatmul.msk.f32.gmra.mxu3 %vm1620_vm7, %v1597_v60  ;;  %3191 = vmatmul.msk.f32.gmra.mxu1 %vm947_vm2, %v1862_v32  ;;  %v1851_v60 = vld [vmem:[%s4491_s13 + $0x38] sm:$0xff] }
 0x53c   : > { %v1600_v61 = vpop.f32.mrf.mxu2 }
 0x53d   : > { %3182 = vmatmul.msk.f32.gmra.mxu3 %vm1620_vm7, %v1600_v61  ;;  %3192 = vmatmul.msk.f32.gmra.mxu1 %vm947_vm2, %v1863_v41  ;;  %v1871_v61 = vld [vmem:[%s4492_s14 + $0x58] sm:$0xff] }
 0x544   : > { %v1603_v62 = vpop.f32.mrf.mxu2 }
 0x545   : > { %3185 = vmatmul.msk.f32.vlgmr.msrb.gmra.mxu0 %vm1620_vm7, %v1603_v62  ;;  %3193 = vmatmul.msk.f32.gmra.mxu1 %vm947_vm2, %v1864_v47  ;;  %v1852_v62 = vld [vmem:[%s4491_s13 + $0x40] sm:$0xff] }
 0x54c   : > { %v1606_v63 = vpop.f32.mrf.mxu2 }
 0x54d   : > { %3186 = vmatmul.msk.f32.gmra.mxu0 %vm1620_vm7, %v1606_v63  ;;  %3194 = vmatmul.msk.f32.gmra.mxu1 %vm947_vm2, %v1865_v49  ;;  %v1872_v63 = vld [vmem:[%s4492_s14 + $0x60] sm:$0xff] }
 0x554   : > { %v1609_v0 = vpop.f32.mrf.mxu2 }
 0x555   : > { %3187 = vmatmul.msk.f32.gmra.mxu0 %vm1620_vm7, %v1609_v0  ;;  %3195 = vmatmul.msk.f32.gmra.mxu1 %vm947_vm2, %v1866_v51  ;;  %v1853_v0 = vld [vmem:[%s4491_s13 + $0x48] sm:$0xff] }
 0x55c   : > { %v1612_v1 = vpop.f32.mrf.mxu2 }
 0x55d   : > { %3188 = vmatmul.msk.f32.gmra.mxu0 %vm1620_vm7, %v1612_v1  ;;  %3196 = vmatmul.msk.f32.gmra.mxu1 %vm947_vm2, %v1867_v53  ;;  %v1873_v1 = vld [vmem:[%s4492_s14 + $0x68] sm:$0xff] }
 0x562   : > { %v1654_v2 = vpop.f32.mrf.mxu0 }
 0x563   : > { %v1686_v37 = vadd.f32 %v1669_v36, %v1654_v2  ;;  %v1854_v2 = vld [vmem:[%s4491_s13 + $0x50] sm:$0xff] }
 0x565   : > { %3197 = vmatmul.msk.f32.gmra.mxu1 %vm947_vm2, %v1868_v55 }
 0x56a   : > { %v1657_v3 = vpop.f32.mrf.mxu0 }
 0x56b   : > { %v1687_v33 = vadd.f32 %v1674_v30, %v1657_v3  ;;  %v1874_v3 = vld [vmem:[%s4492_s14 + $0x70] sm:$0xff] }
 0x56d   : > { %3198 = vmatmul.msk.f32.gmra.mxu1 %vm947_vm2, %v1869_v57 }
 0x572   : > { %v1660_v4 = vpop.f32.mrf.mxu0 }
 0x573   : > { %v1688_v28 = vadd.f32 %v1679_v26, %v1660_v4  ;;  %v1855_v4 = vld [vmem:[%s4491_s13 + $0x58] sm:$0xff] }
 0x575   : > { %3199 = vmatmul.msk.f32.gmra.mxu1 %vm947_vm2, %v1870_v59 }
 0x57a   : > { %v1663_v7 = vpop.f32.mrf.mxu0 }
 0x57b   : > { %v1689_v29 = vadd.f32 %v1684_v23, %v1663_v7 }
 0x57d   : > { %3200 = vmatmul.msk.f32.gmra.mxu1 %vm947_vm2, %v1871_v61 }
 0x582   : > { %v1724_v5 = vpop.f32.mrf.mxu1 }
 0x583   : > { %v1736_v14 = vadd.f32 %v1724_v5, %v1686_v37  ;;  %v1875_v5 = vld [vmem:[%s4492_s14 + $0x78] sm:$0xff] }
 0x585   : > { %3201 = vmatmul.msk.f32.gmra.mxu1 %vm947_vm2, %v1872_v63 }
 0x58a   : > { %v1727_v8 = vpop.f32.mrf.mxu1 }
 0x58b   : > { %v1737_v38 = vadd.f32 %v1727_v8, %v1687_v33  ;;  %v2106_v8 = vld [vmem:[%s4493_s15] sm:$0xf] }
 0x58c   : > { %3221 = vmatpush.msk.msra.mxu0 %vm1325_vm4, %v2106_v8 }
 0x58d   : > { %3202 = vmatmul.msk.f32.gmra.mxu1 %vm947_vm2, %v1873_v1 }
 0x592   : > { %v1730_v12 = vpop.f32.mrf.mxu1 }
 0x593   : > { %v1738_v34 = vadd.f32 %v1730_v12, %v1688_v28  ;;  %v1859_v12 = vld [vmem:[%s4491_s13 + $0x78] sm:$0xff] }
 0x595   : > { %3203 = vmatmul.msk.f32.gmra.mxu1 %vm947_vm2, %v1874_v3 }
 0x59a   : > { %v1733_v27 = vpop.f32.mrf.mxu1 }
 0x59b   : > { %v1739_v35 = vadd.f32 %v1733_v27, %v1689_v29 }
 0x59d   : > { %3204 = vmatmul.msk.f32.gmra.mxu1 %vm947_vm2, %v1875_v5 }
 0x5a2   : > { %v1941_v7 = vpop.f32.mrf.mxu1 }
 0x5a8   : > { %v1774_v6 = vpop.f32.mrf.mxu3 }
 0x5a9   : > { %v1786_v20 = vadd.f32 %v1774_v6, %v1736_v14  ;;  %v1856_v6 = vld [vmem:[%s4491_s13 + $0x60] sm:$0xff] }
 0x5aa   : > { %v1944_v11 = vpop.f32.mrf.mxu1 }
 0x5b0   : > { %v1777_v9 = vpop.f32.mrf.mxu3 }
 0x5b1   : > { %v1787_v17 = vadd.f32 %v1777_v9, %v1737_v38  ;;  %v1857_v9 = vld [vmem:[%s4491_s13 + $0x68] sm:$0xff] }
 0x5b8   : > { %v1780_v16 = vpop.f32.mrf.mxu3 }
 0x5b9   : > { %v1788_v39 = vadd.f32 %v1780_v16, %v1738_v34 }
 0x5c0   : > { %v1783_v31 = vpop.f32.mrf.mxu3 }
 0x5c1   : > { %v1789_v40 = vadd.f32 %v1783_v31, %v1739_v35 }
 0x5c2   : > { %v1824_v10 = vpop.f32.mrf.mxu0 }
 0x5c3   : > { %v1836_v42 = vadd.f32 %v1824_v10, %v1786_v20  ;;  %v1858_v10 = vld [vmem:[%s4491_s13 + $0x70] sm:$0xff]  ;;  %v3238_v20 = vld [vmem:[%s4493_s15 + $0xc] sm:$0xf] }
 0x5c5   : > { %v1840_v45 = vmax.f32 %v1836_v42, 0.0 }
 0x5ca   : > { %v1827_v13 = vpop.f32.mrf.mxu0 }
 0x5cb   : > { %v1837_v21 = vadd.f32 %v1827_v13, %v1787_v17  ;;  %v1947_v13 = vpop.f32.mrf.mxu1 }
 0x5cd   : > { %v1841_v44 = vmax.f32 %v1837_v21, 0.0 }
 0x5d2   : > { %v1830_v25 = vpop.f32.mrf.mxu0 }
 0x5d3   : > { %v1838_v18 = vadd.f32 %v1830_v25, %v1788_v39  ;;  %v1950_v16 = vpop.f32.mrf.mxu1  ;;  %v3226_v25 = vld [vmem:[%s4493_s15 + $0x4] sm:$0xf] }
 0x5d4   : > { %3227 = vmatpush.msk.msrb.mxu0 %vm1325_vm4, %v3226_v25 }
 0x5d5   : > { %v1842_v43 = vmax.f32 %v1838_v18, 0.0 }
 0x5da   : > { %v1833_v15 = vpop.f32.mrf.mxu0 }
 0x5db   : > { %v1839_v19 = vadd.f32 %v1833_v15, %v1789_v40  ;;  %v1953_v27 = vpop.f32.mrf.mxu1 }
 0x5dd   : > { %v1843_v22 = vmax.f32 %v1839_v19, 0.0 }
 0x5df   : > { %2049 = vmatpush.msrb.mxu3 %v1843_v22 }
 0x5e1   : > { %2050 = vmatpush.msrb.mxu3 %v1842_v43 }
 0x5e3   : > { %2051 = vmatpush.msrb.mxu3 %v1841_v44  ;;  %v1956_v31 = vpop.f32.mrf.mxu1 }
 0x5e5   : > { %2052 = vmatpush.msrb.mxu3 %v1840_v45 }
 0x5e6   : > { %3205 = vmatmul.msk.f32.vlgmr.msrb.gmra.mxu3 %vm947_vm2, %v1844_v46 }
 0x5eb   : > { %v1959_v34 = vpop.f32.mrf.mxu1 }
 0x5ee   : > { %3206 = vmatmul.msk.f32.gmra.mxu3 %vm947_vm2, %v1845_v48 }
 0x5f3   : > { %v1962_v37 = vpop.f32.mrf.mxu1 }
 0x5f6   : > { %3207 = vmatmul.msk.f32.gmra.mxu3 %vm947_vm2, %v1846_v50 }
 0x5fb   : > { %v1965_v15 = vpop.f32.mrf.mxu1 }
 0x5fe   : > { %3208 = vmatmul.msk.f32.gmra.mxu3 %vm947_vm2, %v1847_v52 }
 0x603   : > { %v1968_v19 = vpop.f32.mrf.mxu1 }
 0x606   : > { %3209 = vmatmul.msk.f32.gmra.mxu3 %vm947_vm2, %v1848_v54 }
 0x60b   : > { %v1971_v41 = vpop.f32.mrf.mxu1 }
 0x60e   : > { %3210 = vmatmul.msk.f32.gmra.mxu3 %vm947_vm2, %v1849_v56 }
 0x613   : > { %v1974_v44 = vpop.f32.mrf.mxu1 }
 0x616   : > { %3211 = vmatmul.msk.f32.gmra.mxu3 %vm947_vm2, %v1850_v58 }
 0x61b   : > { %v1977_v48 = vpop.f32.mrf.mxu1 }
 0x61e   : > { %3212 = vmatmul.msk.f32.gmra.mxu3 %vm947_vm2, %v1851_v60 }
 0x623   : > { %v1980_v52 = vpop.f32.mrf.mxu1 }
 0x626   : > { %3213 = vmatmul.msk.f32.gmra.mxu3 %vm947_vm2, %v1852_v62 }
 0x62b   : > { %v1983_v55 = vpop.f32.mrf.mxu1 }
 0x62e   : > { %3214 = vmatmul.msk.f32.gmra.mxu3 %vm947_vm2, %v1853_v0 }
 0x633   : > { %v1986_v58 = vpop.f32.mrf.mxu1 }
 0x636   : > { %3215 = vmatmul.msk.f32.gmra.mxu3 %vm947_vm2, %v1854_v2 }
 0x63e   : > { %3216 = vmatmul.msk.f32.gmra.mxu3 %vm947_vm2, %v1855_v4 }
 0x646   : > { %3217 = vmatmul.msk.f32.gmra.mxu3 %vm947_vm2, %v1856_v6  ;;  %v2353_v6 = vld [vmem:[%s4496_s18] sm:$0xff] }
 0x64e   : > { %3218 = vmatmul.msk.f32.gmra.mxu3 %vm947_vm2, %v1857_v9  ;;  %v2354_v9 = vld [vmem:[%s4496_s18 + $0x8] sm:$0xff] }
 0x656   : > { %3219 = vmatmul.msk.f32.gmra.mxu3 %vm947_vm2, %v1858_v10 }
 0x65e   : > { %3220 = vmatmul.msk.f32.gmra.mxu3 %vm947_vm2, %v1859_v12  ;;  %v2169_v12 = vpop.permute.xlu1 %2168 }
 0x669   : > { %v2054_v23 = vpop.f32.mrf.mxu3 }
 0x66a   : > { %v2055_v24 = vadd.f32 %v2054_v23, %v1941_v7  ;;  %v2164_v23 = vpop.permute.xlu2 %2163 }
 0x66c   : > { %3222 = vmatmul.msk.f32.vlgmr.msra.gmra.mxu0 %vm1312_vm5, %v2055_v24 }
 0x66d   : > { %3239 = vmatpush.msk.msra.mxu0 %vm1325_vm4, %v3238_v20 }
 0x671   : > { %v2057_v26 = vpop.f32.mrf.mxu3 }
 0x672   : > { %v2058_v28 = vadd.f32 %v2057_v26, %v1944_v11  ;;  %v2159_v26 = vpop.permute.xlu0 %2158 }
 0x674   : > { %3223 = vmatmul.msk.f32.gmra.mxu0 %vm1312_vm5, %v2058_v28  ;;  %v2356_v28 = vld [vmem:[%s4496_s18 + $0x18] sm:$0xff] }
 0x679   : > { %v2060_v29 = vpop.f32.mrf.mxu3 }
 0x67a   : > { %v2061_v30 = vadd.f32 %v2060_v29, %v1947_v13  ;;  %v2355_v13 = vld [vmem:[%s4496_s18 + $0x10] sm:$0xff] }
 0x67c   : > { %3224 = vmatmul.msk.f32.gmra.mxu0 %vm1312_vm5, %v2061_v30 }
 0x681   : > { %v2063_v32 = vpop.f32.mrf.mxu3 }
 0x682   : > { %v2064_v33 = vadd.f32 %v2063_v32, %v1950_v16  ;;  %v2154_v32 = vpop.permute.xlu1 %2153 }
 0x684   : > { %3225 = vmatmul.msk.f32.gmra.mxu0 %vm1312_vm5, %v2064_v33 }
 0x689   : > { %v2066_v35 = vpop.f32.mrf.mxu3 }
 0x68a   : > { %v2067_v36 = vadd.f32 %v2066_v35, %v1953_v27 }
 0x68c   : > { %3228 = vmatmul.msk.f32.vlgmr.msrb.gmra.mxu0 %vm1312_vm5, %v2067_v36 }
 0x691   : > { %v2069_v38 = vpop.f32.mrf.mxu3 }
 0x692   : > { %v2070_v39 = vadd.f32 %v2069_v38, %v1956_v31 }
 0x694   : > { %3229 = vmatmul.msk.f32.gmra.mxu0 %vm1312_vm5, %v2070_v39 }
 0x699   : > { %v2072_v40 = vpop.f32.mrf.mxu3 }
 0x69a   : > { %v2073_v14 = vadd.f32 %v2072_v40, %v1959_v34 }
 0x69c   : > { %3230 = vmatmul.msk.f32.gmra.mxu0 %vm1312_vm5, %v2073_v14 }
 0x6a1   : > { %v2075_v17 = vpop.f32.mrf.mxu3 }
 0x6a2   : > { %v2076_v18 = vadd.f32 %v2075_v17, %v1962_v37 }
 0x6a4   : > { %3231 = vmatmul.msk.f32.gmra.mxu0 %vm1312_vm5, %v2076_v18 }
 0x6a9   : > { %v2078_v21 = vpop.f32.mrf.mxu3 }
 0x6aa   : > { %v2079_v22 = vadd.f32 %v2078_v21, %v1965_v15 }
 0x6ac   : > { %3234 = vmatmul.msk.f32.vlgmr.msra.gmra.mxu2 %vm1312_vm5, %v2079_v22 }
 0x6b1   : > { %v2081_v42 = vpop.f32.mrf.mxu3 }
 0x6b2   : > { %v2082_v43 = vadd.f32 %v2081_v42, %v1968_v19  ;;  %v2357_v19 = vld [vmem:[%s4496_s18 + $0x20] sm:$0xff] }
 0x6b3   : > { %v2329_v42 = vld [vmem:[%s4495_s17] sm:$0xff] }
 0x6b4   : > { %3235 = vmatmul.msk.f32.gmra.mxu2 %vm1312_vm5, %v2082_v43  ;;  %v2358_v43 = vld [vmem:[%s4496_s18 + $0x28] sm:$0xff] }
 0x6b9   : > { %v2084_v45 = vpop.f32.mrf.mxu3 }
 0x6ba   : > { %v2085_v46 = vadd.f32 %v2084_v45, %v1971_v41  ;;  %v2359_v45 = vld [vmem:[%s4496_s18 + $0x30] sm:$0xff] }
 0x6bc   : > { %3236 = vmatmul.msk.f32.gmra.mxu2 %vm1312_vm5, %v2085_v46  ;;  %v2331_v46 = vld [vmem:[%s4495_s17 + $0x10] sm:$0xff] }
 0x6c1   : > { %v2087_v47 = vpop.f32.mrf.mxu3 }
 0x6c2   : > { %v2088_v49 = vadd.f32 %v2087_v47, %v1974_v44  ;;  %v2330_v44 = vld [vmem:[%s4495_s17 + $0x8] sm:$0xff]  ;;  %v2360_v47 = vld [vmem:[%s4496_s18 + $0x38] sm:$0xff] }
 0x6c4   : > { %3237 = vmatmul.msk.f32.gmra.mxu2 %vm1312_vm5, %v2088_v49  ;;  %v2361_v49 = vld [vmem:[%s4496_s18 + $0x40] sm:$0xff] }
 0x6c9   : > { %v2090_v50 = vpop.f32.mrf.mxu3 }
 0x6ca   : > { %v2091_v51 = vadd.f32 %v2090_v50, %v1977_v48  ;;  %v2332_v48 = vld [vmem:[%s4495_s17 + $0x18] sm:$0xff]  ;;  %v2333_v50 = vld [vmem:[%s4495_s17 + $0x20] sm:$0xff] }
 0x6cc   : > { %3240 = vmatmul.msk.f32.vlgmr.msra.gmra.mxu0 %vm1312_vm5, %v2091_v51  ;;  %3244 = vmatmul.msk.f32.vlgmr.msrb.gmra.mxu2 %vm947_vm2, %v2353_v6  ;;  %v2362_v51 = vld [vmem:[%s4496_s18 + $0x48] sm:$0xff] }
 0x6cd   : > { %v2370_v6 = vld [vmem:[%s4496_s18 + $0x88] sm:$0xff] }
 0x6d1   : > { %v2093_v53 = vpop.f32.mrf.mxu3 }
 0x6d2   : > { %v2094_v54 = vadd.f32 %v2093_v53, %v1980_v52  ;;  %v2334_v52 = vld [vmem:[%s4495_s17 + $0x28] sm:$0xff]  ;;  %v2363_v53 = vld [vmem:[%s4496_s18 + $0x50] sm:$0xff] }
 0x6d4   : > { %3241 = vmatmul.msk.f32.gmra.mxu0 %vm1312_vm5, %v2094_v54  ;;  %3245 = vmatmul.msk.f32.gmra.mxu2 %vm947_vm2, %v2354_v9  ;;  %v2335_v54 = vld [vmem:[%s4495_s17 + $0x30] sm:$0xff] }
 0x6d5   : > { %v2371_v9 = vld [vmem:[%s4496_s18 + $0x90] sm:$0xff] }
 0x6d9   : > { %v2096_v56 = vpop.f32.mrf.mxu3 }
 0x6da   : > { %v2097_v57 = vadd.f32 %v2096_v56, %v1983_v55  ;;  %v2364_v55 = vld [vmem:[%s4496_s18 + $0x58] sm:$0xff] }
 0x6db   : > { %v2336_v56 = vld [vmem:[%s4495_s17 + $0x38] sm:$0xff] }
 0x6dc   : > { %3242 = vmatmul.msk.f32.gmra.mxu0 %vm1312_vm5, %v2097_v57  ;;  %3246 = vmatmul.msk.f32.gmra.mxu2 %vm947_vm2, %v2355_v13  ;;  %v2365_v57 = vld [vmem:[%s4496_s18 + $0x60] sm:$0xff]  ;;  %v2344_v13 = vld [vmem:[%s4495_s17 + $0x78] sm:$0xff] }
 0x6e1   : > { %v2099_v59 = vpop.f32.mrf.mxu3 }
 0x6e2   : > { %v2100_v60 = vadd.f32 %v2099_v59, %v1986_v58  ;;  %v2337_v58 = vld [vmem:[%s4495_s17 + $0x40] sm:$0xff]  ;;  %v2366_v59 = vld [vmem:[%s4496_s18 + $0x68] sm:$0xff] }
 0x6e4   : > { %3243 = vmatmul.msk.f32.gmra.mxu0 %vm1312_vm5, %v2100_v60  ;;  %3247 = vmatmul.msk.f32.gmra.mxu2 %vm947_vm2, %v2356_v28  ;;  %v2338_v60 = vld [vmem:[%s4495_s17 + $0x48] sm:$0xff] }
 0x6e5   : > { %v2374_v28 = vld [vmem:[%s4496_s18 + $0xa8] sm:$0xff] }
 0x6e9   : > { %v2139_v61 = vpop.f32.mrf.mxu0 }
 0x6ea   : > { %v2171_v33 = vadd.f32 %v2154_v32, %v2139_v61  ;;  %v2367_v61 = vld [vmem:[%s4496_s18 + $0x70] sm:$0xff] }
 0x6ec   : > { %3248 = vmatmul.msk.f32.gmra.mxu2 %vm947_vm2, %v2357_v19 }
 0x6f1   : > { %v2142_v62 = vpop.f32.mrf.mxu0 }
 0x6f2   : > { %v2172_v29 = vadd.f32 %v2159_v26, %v2142_v62  ;;  %v2339_v62 = vld [vmem:[%s4495_s17 + $0x50] sm:$0xff] }
 0x6f4   : > { %3249 = vmatmul.msk.f32.gmra.mxu2 %vm947_vm2, %v2358_v43 }
 0x6f9   : > { %v2145_v63 = vpop.f32.mrf.mxu0 }
 0x6fa   : > { %v2173_v24 = vadd.f32 %v2164_v23, %v2145_v63  ;;  %v2368_v63 = vld [vmem:[%s4496_s18 + $0x78] sm:$0xff]  ;;  %v2373_v23 = vld [vmem:[%s4496_s18 + $0xa0] sm:$0xff] }
 0x6fc   : > { %3250 = vmatmul.msk.f32.gmra.mxu2 %vm947_vm2, %v2359_v45 }
 0x701   : > { %v2148_v0 = vpop.f32.mrf.mxu0 }
 0x702   : > { %v2174_v25 = vadd.f32 %v2169_v12, %v2148_v0  ;;  %v2340_v0 = vld [vmem:[%s4495_s17 + $0x58] sm:$0xff] }
 0x703   : > { %v2372_v12 = vld [vmem:[%s4496_s18 + $0x98] sm:$0xff] }
 0x704   : > { %3251 = vmatmul.msk.f32.gmra.mxu2 %vm947_vm2, %v2360_v47 }
 0x709   : > { %v2209_v1 = vpop.f32.mrf.mxu0 }
 0x70a   : > { %v2221_v38 = vadd.f32 %v2209_v1, %v2171_v33  ;;  %v3298_v1 = vld [vmem:[%s4497_s19 + $0x8] sm:$0xff]  ;;  %v2375_v33 = vld [vmem:[%s4496_s18 + $0xb0] sm:$0xff] }
 0x70b   : > { %2830 = vmatpush.msra.mxu3 %v3298_v1 }
 0x70c   : > { %3252 = vmatmul.msk.f32.gmra.mxu2 %vm947_vm2, %v2361_v49 }
 0x711   : > { %v2212_v2 = vpop.f32.mrf.mxu0 }
 0x712   : > { %v2222_v34 = vadd.f32 %v2212_v2, %v2172_v29  ;;  %v2369_v2 = vld [vmem:[%s4496_s18 + $0x80] sm:$0xff] }
 0x714   : > { %3253 = vmatmul.msk.f32.gmra.mxu2 %vm947_vm2, %v2362_v51 }
 0x719   : > { %v2215_v3 = vpop.f32.mrf.mxu0 }
 0x71a   : > { %v2223_v30 = vadd.f32 %v2215_v3, %v2173_v24  ;;  %v2341_v3 = vld [vmem:[%s4495_s17 + $0x60] sm:$0xff] }
 0x71c   : > { %3254 = vmatmul.msk.f32.gmra.mxu2 %vm947_vm2, %v2363_v53  ;;  %v3305_v53 = vld [vmem:[%s4497_s19 + $0x10] sm:$0xff] }
 0x721   : > { %v2218_v5 = vpop.f32.mrf.mxu0 }
 0x722   : > { %v2224_v31 = vadd.f32 %v2218_v5, %v2174_v25  ;;  %v2705_v5 = vld [vmem:[%s4497_s19] sm:$0xff] }
 0x723   : > { %2739 = vmatpush.msra.mxu1 %v2705_v5  ;;  %v2345_v25 = vld [vmem:[%s4495_s17 + $0x80] sm:$0xff] }
 0x724   : > { %3255 = vmatmul.msk.f32.gmra.mxu2 %vm947_vm2, %v2364_v55 }
 0x725   : > { %2891 = vmatpush.msrb.mxu1 %v3305_v53  ;;  %v2767_v53 = vpop.permute.xlu0 %2766 }
 0x72c   : > { %3256 = vmatmul.msk.f32.gmra.mxu2 %vm947_vm2, %v2365_v57 }
 0x72f   : > { %v2259_v4 = vpop.f32.mrf.mxu2 }
 0x730   : > { %v2271_v14 = vadd.f32 %v2259_v4, %v2221_v38  ;;  %v2376_v38 = vld [vmem:[%s4496_s18 + $0xb8] sm:$0xff] }
 0x734   : > { %3257 = vmatmul.msk.f32.gmra.mxu2 %vm947_vm2, %v2366_v59 }
 0x737   : > { %v2262_v7 = vpop.f32.mrf.mxu2 }
 0x738   : > { %v2272_v39 = vadd.f32 %v2262_v7, %v2222_v34  ;;  %v2342_v7 = vld [vmem:[%s4495_s17 + $0x68] sm:$0xff] }
 0x73c   : > { %3258 = vmatmul.msk.f32.gmra.mxu2 %vm947_vm2, %v2367_v61 }
 0x73f   : > { %v2265_v11 = vpop.f32.mrf.mxu2 }
 0x740   : > { %v2273_v35 = vadd.f32 %v2265_v11, %v2223_v30  ;;  %v2346_v30 = vld [vmem:[%s4495_s17 + $0x88] sm:$0xff] }
 0x744   : > { %3259 = vmatmul.msk.f32.gmra.mxu2 %vm947_vm2, %v2368_v63 }
 0x747   : > { %v2268_v27 = vpop.f32.mrf.mxu2 }
 0x748   : > { %v2274_v36 = vadd.f32 %v2268_v27, %v2224_v31 }
 0x749   : > { %v2309_v8 = vpop.f32.mrf.mxu0 }
 0x74a   : > { %v2321_v20 = vadd.f32 %v2309_v8, %v2271_v14 }
 0x74c   : > { %v2325_v41 = vmax.f32 %v2321_v20, 0.0  ;;  %3260 = vmatmul.msk.f32.gmra.mxu2 %vm947_vm2, %v2369_v2 }
 0x74f   : > { %v2466_v4 = vpop.f32.mrf.mxu2 }
 0x751   : > { %v2312_v10 = vpop.f32.mrf.mxu0 }
 0x752   : > { %v2322_v17 = vadd.f32 %v2312_v10, %v2272_v39  ;;  %v2343_v10 = vld [vmem:[%s4495_s17 + $0x70] sm:$0xff] }
 0x754   : > { %v2326_v22 = vmax.f32 %v2322_v17, 0.0  ;;  %3261 = vmatmul.msk.f32.gmra.mxu2 %vm947_vm2, %v2370_v6 }
 0x757   : > { %v2469_v8 = vpop.f32.mrf.mxu2 }
 0x759   : > { %v2315_v16 = vpop.f32.mrf.mxu0 }
 0x75a   : > { %v2323_v40 = vadd.f32 %v2315_v16, %v2273_v35  ;;  %v2347_v35 = vld [vmem:[%s4495_s17 + $0x90] sm:$0xff] }
 0x75c   : > { %v2327_v21 = vmax.f32 %v2323_v40, 0.0  ;;  %3262 = vmatmul.msk.f32.gmra.mxu2 %vm947_vm2, %v2371_v9  ;;  %v2348_v40 = vld [vmem:[%s4495_s17 + $0x98] sm:$0xff] }
 0x75f   : > { %v2472_v11 = vpop.f32.mrf.mxu2 }
 0x761   : > { %v2318_v37 = vpop.f32.mrf.mxu0 }
 0x762   : > { %v2324_v15 = vadd.f32 %v2318_v37, %v2274_v36 }
 0x764   : > { %v2328_v18 = vmax.f32 %v2324_v15, 0.0  ;;  %3263 = vmatmul.msk.f32.gmra.mxu2 %vm947_vm2, %v2372_v12 }
 0x766   : > { %2622 = vmatpush.msrb.mxu0 %v2328_v18  ;;  %v2349_v18 = vld [vmem:[%s4495_s17 + $0xa0] sm:$0xff] }
 0x767   : > { %v2475_v16 = vpop.f32.mrf.mxu2 }
 0x768   : > { %2623 = vmatpush.msrb.mxu0 %v2327_v21 }
 0x76a   : > { %2624 = vmatpush.msrb.mxu0 %v2326_v22  ;;  %v2350_v22 = vld [vmem:[%s4495_s17 + $0xa8] sm:$0xff] }
 0x76c   : > { %2625 = vmatpush.msrb.mxu0 %v2325_v41  ;;  %3264 = vmatmul.msk.f32.gmra.mxu2 %vm947_vm2, %v2373_v23 }
 0x76d   : > { %3268 = vmatmul.msk.f32.vlgmr.msrb.gmra.mxu0 %vm947_vm2, %v2329_v42 }
 0x76f   : > { %v2478_v26 = vpop.f32.mrf.mxu2 }
 0x774   : > { %3265 = vmatmul.msk.f32.gmra.mxu2 %vm947_vm2, %v2374_v28 }
 0x775   : > { %3269 = vmatmul.msk.f32.gmra.mxu0 %vm947_vm2, %v2330_v44  ;;  %v2351_v44 = vld [vmem:[%s4495_s17 + $0xb0] sm:$0xff] }
 0x777   : > { %v2481_v31 = vpop.f32.mrf.mxu2 }
 0x77c   : > { %3266 = vmatmul.msk.f32.gmra.mxu2 %vm947_vm2, %v2375_v33 }
 0x77d   : > { %3270 = vmatmul.msk.f32.gmra.mxu0 %vm947_vm2, %v2331_v46 }
 0x77f   : > { %v2484_v36 = vpop.f32.mrf.mxu2 }
 0x784   : > { %3267 = vmatmul.msk.f32.gmra.mxu2 %vm947_vm2, %v2376_v38 }
 0x785   : > { %3271 = vmatmul.msk.f32.gmra.mxu0 %vm947_vm2, %v2332_v48  ;;  %v2352_v48 = vld [vmem:[%s4495_s17 + $0xb8] sm:$0xff] }
 0x787   : > { %v2487_v15 = vpop.f32.mrf.mxu2 }
 0x78d   : > { %3272 = vmatmul.msk.f32.gmra.mxu0 %vm947_vm2, %v2333_v50 }
 0x78f   : > { %v2490_v19 = vpop.f32.mrf.mxu2 }
 0x795   : > { %3273 = vmatmul.msk.f32.gmra.mxu0 %vm947_vm2, %v2334_v52 }
 0x797   : > { %v2493_v42 = vpop.f32.mrf.mxu2 }
 0x79d   : > { %3274 = vmatmul.msk.f32.gmra.mxu0 %vm947_vm2, %v2335_v54 }
 0x79f   : > { %v2496_v46 = vpop.f32.mrf.mxu2 }
 0x7a5   : > { %3275 = vmatmul.msk.f32.gmra.mxu0 %vm947_vm2, %v2336_v56 }
 0x7a7   : > { %v2499_v50 = vpop.f32.mrf.mxu2 }
 0x7ad   : > { %3276 = vmatmul.msk.f32.gmra.mxu0 %vm947_vm2, %v2337_v58 }
 0x7af   : > { %v2502_v55 = vpop.f32.mrf.mxu2 }
 0x7b5   : > { %3277 = vmatmul.msk.f32.gmra.mxu0 %vm947_vm2, %v2338_v60 }
 0x7b7   : > { %v2505_v59 = vpop.f32.mrf.mxu2 }
 0x7bd   : > { %3278 = vmatmul.msk.f32.gmra.mxu0 %vm947_vm2, %v2339_v62  ;;  %v3312_v62 = vld [vmem:[%s4497_s19 + $0x18] sm:$0xff] }
 0x7be   : > { %2952 = vmatpush.msrb.mxu3 %v3312_v62 }
 0x7bf   : > { %v2508_v63 = vpop.f32.mrf.mxu2 }
 0x7c5   : > { %3279 = vmatmul.msk.f32.gmra.mxu0 %vm947_vm2, %v2340_v0 }
 0x7c7   : > { %v2511_v2 = vpop.f32.mrf.mxu2 }
 0x7cd   : > { %3280 = vmatmul.msk.f32.gmra.mxu0 %vm947_vm2, %v2341_v3 }
 0x7cf   : > { %v2514_v6 = vpop.f32.mrf.mxu2 }
 0x7d5   : > { %3281 = vmatmul.msk.f32.gmra.mxu0 %vm947_vm2, %v2342_v7 }
 0x7dd   : > { %3282 = vmatmul.msk.f32.gmra.mxu0 %vm947_vm2, %v2343_v10  ;;  %v2517_v10 = vpop.f32.mrf.mxu2 }
 0x7e5   : > { %3283 = vmatmul.msk.f32.gmra.mxu0 %vm947_vm2, %v2344_v13  ;;  %v2520_v13 = vpop.f32.mrf.mxu2 }
 0x7ea   : > { %v2627_v24 = vpop.f32.mrf.mxu0 }
 0x7eb   : > { %v2628_v27 = vadd.f32 %v2627_v24, %v2466_v4 }
 0x7ed   : > { %3284 = vmatmul.msk.f32.gmra.mxu0 %vm947_vm2, %v2345_v25  ;;  %3292 = vmatmul.msk.f32.vlgmr.msra.gmra.mxu1 %vm1042_vm3, %v2628_v27  ;;  %v2523_v24 = vpop.f32.mrf.mxu2 }
 0x7f2   : > { %v2630_v29 = vpop.f32.mrf.mxu0 }
 0x7f3   : > { %v2631_v32 = vadd.f32 %v2630_v29, %v2469_v8 }
 0x7f5   : > { %3285 = vmatmul.msk.f32.gmra.mxu0 %vm947_vm2, %v2346_v30  ;;  %3293 = vmatmul.msk.f32.gmra.mxu1 %vm1042_vm3, %v2631_v32  ;;  %v2526_v28 = vpop.f32.mrf.mxu2 }
 0x7fa   : > { %v2633_v34 = vpop.f32.mrf.mxu0 }
 0x7fb   : > { %v2634_v37 = vadd.f32 %v2633_v34, %v2472_v11 }
 0x7fd   : > { %3286 = vmatmul.msk.f32.gmra.mxu0 %vm947_vm2, %v2347_v35  ;;  %3294 = vmatmul.msk.f32.gmra.mxu1 %vm1042_vm3, %v2634_v37  ;;  %v2529_v32 = vpop.f32.mrf.mxu2 }
 0x802   : > { %v2636_v39 = vpop.f32.mrf.mxu0 }
 0x803   : > { %v2637_v14 = vadd.f32 %v2636_v39, %v2475_v16 }
 0x805   : > { %3287 = vmatmul.msk.f32.gmra.mxu0 %vm947_vm2, %v2348_v40  ;;  %3295 = vmatmul.msk.f32.gmra.mxu1 %vm1042_vm3, %v2637_v14  ;;  %v2532_v35 = vpop.f32.mrf.mxu2 }
 0x80a   : > { %v2639_v17 = vpop.f32.mrf.mxu0 }
 0x80b   : > { %v2640_v20 = vadd.f32 %v2639_v17, %v2478_v26 }
 0x80d   : > { %3288 = vmatmul.msk.f32.gmra.mxu0 %vm947_vm2, %v2349_v18  ;;  %3296 = vmatmul.msk.f32.gmra.mxu1 %vm1042_vm3, %v2640_v20  ;;  %v2535_v38 = vpop.f32.mrf.mxu2 }
 0x812   : > { %v2642_v21 = vpop.f32.mrf.mxu0 }
 0x813   : > { %v2643_v41 = vadd.f32 %v2642_v21, %v2481_v31 }
 0x815   : > { %3289 = vmatmul.msk.f32.gmra.mxu0 %vm947_vm2, %v2350_v22  ;;  %3297 = vmatmul.msk.f32.gmra.mxu1 %vm1042_vm3, %v2643_v41 }
 0x81a   : > { %v2645_v43 = vpop.f32.mrf.mxu0 }
 0x81b   : > { %v2646_v45 = vadd.f32 %v2645_v43, %v2484_v36 }
 0x81d   : > { %3290 = vmatmul.msk.f32.gmra.mxu0 %vm947_vm2, %v2351_v44  ;;  %3299 = vmatmul.msk.f32.vlgmr.msra.gmra.mxu3 %vm1042_vm3, %v2646_v45 }
 0x822   : > { %v2648_v47 = vpop.f32.mrf.mxu0 }
 0x823   : > { %v2649_v49 = vadd.f32 %v2648_v47, %v2487_v15 }
 0x825   : > { %3291 = vmatmul.msk.f32.gmra.mxu0 %vm947_vm2, %v2352_v48  ;;  %3300 = vmatmul.msk.f32.gmra.mxu3 %vm1042_vm3, %v2649_v49 }
 0x82a   : > { %v2651_v51 = vpop.f32.mrf.mxu0 }
 0x82b   : > { %v2652_v52 = vadd.f32 %v2651_v51, %v2490_v19 }
 0x82d   : > { %3301 = vmatmul.msk.f32.gmra.mxu3 %vm1042_vm3, %v2652_v52 }
 0x832   : > { %v2654_v54 = vpop.f32.mrf.mxu0 }
 0x833   : > { %v2655_v56 = vadd.f32 %v2654_v54, %v2493_v42 }
 0x835   : > { %3302 = vmatmul.msk.f32.gmra.mxu3 %vm1042_vm3, %v2655_v56 }
 0x83a   : > { %v2657_v57 = vpop.f32.mrf.mxu0 }
 0x83b   : > { %v2658_v58 = vadd.f32 %v2657_v57, %v2496_v46  ;;  %v2762_v46 = vpop.permute.xlu2 %2761 }
 0x83d   : > { %3303 = vmatmul.msk.f32.gmra.mxu3 %vm1042_vm3, %v2658_v58 }
 0x842   : > { %v2660_v60 = vpop.f32.mrf.mxu0 }
 0x843   : > { %v2661_v61 = vadd.f32 %v2660_v60, %v2499_v50  ;;  %v2772_v60 = vpop.permute.xlu1 %2771 }
 0x845   : > { %3304 = vmatmul.msk.f32.gmra.mxu3 %vm1042_vm3, %v2661_v61 }
 0x84a   : > { %v2663_v0 = vpop.f32.mrf.mxu0 }
 0x84b   : > { %v2664_v1 = vadd.f32 %v2663_v0, %v2502_v55 }
 0x84d   : > { %3306 = vmatmul.msk.f32.vlgmr.msrb.gmra.mxu1 %vm1042_vm3, %v2664_v1 }
 0x852   : > { %v2666_v3 = vpop.f32.mrf.mxu0 }
 0x853   : > { %v2667_v4 = vadd.f32 %v2666_v3, %v2505_v59  ;;  %v2777_v3 = vpop.permute.xlu2 %2776 }
 0x855   : > { %3307 = vmatmul.msk.f32.gmra.mxu1 %vm1042_vm3, %v2667_v4 }
 0x85a   : > { %v2669_v5 = vpop.f32.mrf.mxu0 }
 0x85b   : > { %v2670_v7 = vadd.f32 %v2669_v5, %v2508_v63 }
 0x85d   : > { %3308 = vmatmul.msk.f32.gmra.mxu1 %vm1042_vm3, %v2670_v7 }
 0x862   : > { %v2672_v8 = vpop.f32.mrf.mxu0 }
 0x863   : > { %v2673_v9 = vadd.f32 %v2672_v8, %v2511_v2 }
 0x865   : > { %3309 = vmatmul.msk.f32.gmra.mxu1 %vm1042_vm3, %v2673_v9  ;;  %v2782_v9 = vpop.permute.xlu0 %2781 }
 0x86a   : > { %v2675_v11 = vpop.f32.mrf.mxu0  ;;  %v2741_v15 = vpop.f32.mrf.mxu1 }
 0x86b   : > { %v2676_v12 = vadd.f32 %v2675_v11, %v2514_v6  ;;  %v2789_v47 = vadd.f32 %v2762_v46, %v2741_v15 }
 0x86d   : > { %3310 = vmatmul.msk.f32.gmra.mxu1 %vm1042_vm3, %v2676_v12 }
 0x872   : > { %v2678_v16 = vpop.f32.mrf.mxu0  ;;  %v2744_v14 = vpop.f32.mrf.mxu1 }
 0x873   : > { %v2679_v23 = vadd.f32 %v2678_v16, %v2517_v10  ;;  %v2790_v54 = vadd.f32 %v2767_v53, %v2744_v14 }
 0x875   : > { %3311 = vmatmul.msk.f32.gmra.mxu1 %vm1042_vm3, %v2679_v23 }
 0x87a   : > { %v2681_v25 = vpop.f32.mrf.mxu0  ;;  %v2747_v18 = vpop.f32.mrf.mxu1 }
 0x87b   : > { %v2682_v26 = vadd.f32 %v2681_v25, %v2520_v13  ;;  %v2791_v61 = vadd.f32 %v2772_v60, %v2747_v18 }
 0x87d   : > { %3313 = vmatmul.msk.f32.vlgmr.msrb.gmra.mxu3 %vm1042_vm3, %v2682_v26 }
 0x882   : > { %v2684_v27 = vpop.f32.mrf.mxu0  ;;  %v2750_v20 = vpop.f32.mrf.mxu1 }
 0x883   : > { %v2685_v29 = vadd.f32 %v2684_v27, %v2523_v24  ;;  %v2792_v4 = vadd.f32 %v2777_v3, %v2750_v20  ;;  %v2787_v24 = vpop.permute.xlu1 %2786 }
 0x885   : > { %3314 = vmatmul.msk.f32.gmra.mxu3 %vm1042_vm3, %v2685_v29 }
 0x88a   : > { %v2687_v30 = vpop.f32.mrf.mxu0  ;;  %v2753_v22 = vpop.f32.mrf.mxu1 }
 0x88b   : > { %v2688_v31 = vadd.f32 %v2687_v30, %v2526_v28  ;;  %v2793_v11 = vadd.f32 %v2782_v9, %v2753_v22 }
 0x88d   : > { %3315 = vmatmul.msk.f32.gmra.mxu3 %vm1042_vm3, %v2688_v31 }
 0x892   : > { %v2690_v33 = vpop.f32.mrf.mxu0  ;;  %v2756_v42 = vpop.f32.mrf.mxu1 }
 0x893   : > { %v2691_v34 = vadd.f32 %v2690_v33, %v2529_v32  ;;  %v2794_v25 = vadd.f32 %v2787_v24, %v2756_v42 }
 0x895   : > { %3316 = vmatmul.msk.f32.gmra.mxu3 %vm1042_vm3, %v2691_v34 }
 0x89a   : > { %v2693_v36 = vpop.f32.mrf.mxu0 }
 0x89b   : > { %v2694_v37 = vadd.f32 %v2693_v36, %v2532_v35 }
 0x89d   : > { %3317 = vmatmul.msk.f32.gmra.mxu3 %vm1042_vm3, %v2694_v37 }
 0x8a0   : > { %v2832_v17 = vpop.f32.mrf.mxu3 }
 0x8a1   : > { %v2850_v49 = vadd.f32 %v2832_v17, %v2789_v47 }
 0x8a2   : > { %v2696_v39 = vpop.f32.mrf.mxu0 }
 0x8a3   : > { %v2697_v40 = vadd.f32 %v2696_v39, %v2535_v38 }
 0x8a5   : > { %3318 = vmatmul.msk.f32.gmra.mxu3 %vm1042_vm3, %v2697_v40 }
 0x8a8   : > { %v2835_v19 = vpop.f32.mrf.mxu3 }
 0x8a9   : > { %v2851_v55 = vadd.f32 %v2835_v19, %v2790_v54 }
 0x8b0   : > { %v2838_v21 = vpop.f32.mrf.mxu3 }
 0x8b1   : > { %v2852_v62 = vadd.f32 %v2838_v21, %v2791_v61 }
 0x8b8   : > { %v2841_v41 = vpop.f32.mrf.mxu3 }
 0x8b9   : > { %v2853_v5 = vadd.f32 %v2841_v41, %v2792_v4 }
 0x8c0   : > { %v2844_v43 = vpop.f32.mrf.mxu3 }
 0x8c1   : > { %v2854_v12 = vadd.f32 %v2844_v43, %v2793_v11 }
 0x8c8   : > { %v2847_v45 = vpop.f32.mrf.mxu3 }
 0x8c9   : > { %v2855_v27 = vadd.f32 %v2847_v45, %v2794_v25 }
 0x8ca   : > { %v2893_v44 = vpop.f32.mrf.mxu1 }
 0x8cb   : > { %v2911_v50 = vadd.f32 %v2893_v44, %v2850_v49 }
 0x8d2   : > { %v2896_v48 = vpop.f32.mrf.mxu1 }
 0x8d3   : > { %v2912_v57 = vadd.f32 %v2896_v48, %v2851_v55 }
 0x8da   : > { %v2899_v56 = vpop.f32.mrf.mxu1 }
 0x8db   : > { %v2913_v63 = vadd.f32 %v2899_v56, %v2852_v62 }
 0x8e2   : > { %v2902_v0 = vpop.f32.mrf.mxu1 }
 0x8e3   : > { %v2914_v6 = vadd.f32 %v2902_v0, %v2853_v5 }
 0x8ea   : > { %v2905_v10 = vpop.f32.mrf.mxu1 }
 0x8eb   : > { %v2915_v13 = vadd.f32 %v2905_v10, %v2854_v12 }
 0x8f2   : > { %v2908_v26 = vpop.f32.mrf.mxu1 }
 0x8f3   : > { %v2916_v28 = vadd.f32 %v2908_v26, %v2855_v27 }
 0x900   : > { %v2954_v51 = vpop.f32.mrf.mxu3 }
 0x901   : > { %v2972_v52 = vadd.f32 %v2954_v51, %v2911_v50 }
 0x903   : > { %2978 = vst.msk [vmem:[%s4430_s4] sm:$0xff] %vm769_vm1, %v2972_v52 }
 0x908   : > { %v2957_v58 = vpop.f32.mrf.mxu3 }
 0x909   : > { %v2973_v59 = vadd.f32 %v2957_v58, %v2912_v57 }
 0x90b   : > { %2979 = vst.msk [vmem:[%s4430_s4 + $0x8] sm:$0xff] %vm769_vm1, %v2973_v59 }
 0x910   : > { %v2960_v1 = vpop.f32.mrf.mxu3 }
 0x911   : > { %v2974_v2 = vadd.f32 %v2960_v1, %v2913_v63 }
 0x913   : > { %2980 = vst.msk [vmem:[%s4430_s4 + $0x10] sm:$0xff] %vm769_vm1, %v2974_v2 }
 0x918   : > { %v2963_v7 = vpop.f32.mrf.mxu3 }
 0x919   : > { %v2975_v8 = vadd.f32 %v2963_v7, %v2914_v6 }
 0x91b   : > { %2981 = vst.msk [vmem:[%s4430_s4 + $0x18] sm:$0xff] %vm769_vm1, %v2975_v8 }
 0x920   : > { %v2966_v16 = vpop.f32.mrf.mxu3 }
 0x921   : > { %v2976_v23 = vadd.f32 %v2966_v16, %v2915_v13 }
 0x923   : > { %2982 = vst.msk [vmem:[%s4430_s4 + $0x20] sm:$0xff] %vm769_vm1, %v2976_v23 }
 0x928   : > { %v2969_v29 = vpop.f32.mrf.mxu3 }
 0x929   : > { %v2977_v30 = vadd.f32 %v2969_v29, %v2916_v28 }
 0x92b   : > { %2983 = vst.msk [vmem:[%s4430_s4 + $0x28] sm:$0xff] %vm769_vm1, %v2977_v30 }
 0x92c   : > { %3403 = shalt.err (!%p3400_p3)
}
 0x92d   : > { %s3441_s30 = smov 128   ;;  %s3442_s4 = smov 8  }
 0x92e   : > { %3331 = dma.vmem_to_hbm [thread:$0]  (%p3591_p5), %s2998_s0, 768, %s3000_s26, %s2985_s3, %s3441_s30, %s3441_s30, %s3442_s4  }
 0x92f PF: > { %s4542_s9 = sld [smem:[#allocation5_spill]]  ;;  %p3337_p4 = scmp.ge.s32.totalorder %s3438_s27, 2 }
 0x931   : > { %p3334_p7 = pnand %p3337_p4, %p3595_p6 }
 0x933   : > { %p3335_p8 = pneg %p3334_p7 }
 0x935   : > { %s3014_s23 = sand.u32 1, %s4542_s9  }
 0x936   : > { %s3015_s7 = scalar_lea.sflag [#allocation3], %s3014_s23 }
 0x937   : > { %3421 = dma.done.wait (%p3335_p8), %s3015_s7, 768  }
 0x938   : > { %3423 = vsyncadd (%p3335_p8), %s3015_s7, 4294966528  ;;  %s4544_s27 = sld [smem:[#allocation7_spill]]  ;;  %s4547_s2 = smov %s3430_s25 }
 0x939   : > { %s4545_s6 = sld [smem:[#allocation6_spill]] }
 0x93a   : > { %s4546_s26 = sld [smem:[#allocation8_spill]] }
 0x93e   : > { %p31_p9 = scmp.ge.s32.totalorder %s4544_s27, 4  }
 0x93f   : > { %s4548_s25 = smov %s4545_s6 }
 0x940   :  { %33 = sbr.rel (!%p31_p9) target bundleno = 15 (0xf), region = 154 }
 0x945   :  { %3021 = vsyncpa [#allocation3], 1 }
 0x946   :  { %3023 = vsyncpa [#allocation3 + $0x1], 1 }

</bundles_post_ra>
